<compile_context>
chip_gen: v7x
topology: tpu7x:2x2x1
jax: 0.10.0
libtpu: 0.0.40
codegen_flags: <defaults>
</compile_context>

<pallas_src>
import math
import jax
import jax.numpy as jnp
from jax import lax
from jax.experimental import pallas as pl
from jax.experimental.pallas import tpu as pltpu

# ---------------- problem sizes (small, consistent with the module) ----------
N = 32            # number of graph nodes
IN_DIM = 16       # input feature dim
HID = 32          # hidden dim
NUM_LAYERS = 2
DROP = 0.5        # nn.Dropout(drop) is constructed but never used in forward()

_PER_LAYER_REFS = 11  # w1, asrc1, adst1, b1, w2, asrc2, adst2, b2, fw1, fw2, fb


def _vmem():
    return pl.BlockSpec(memory_space=pltpu.MemorySpace.VMEM)


def _smem():
    return pl.BlockSpec(memory_space=pltpu.MemorySpace.SMEM)


# ---------------- fully fused DualGAT forward kernel --------------------------
def dualgat_kernel(*refs):
    eps_ref = refs[0]                                   # (2*NUM_LAYERS,) in SMEM
    (x_ref, gdv_adj_ref, curv_adj_ref,
     gdv_mask_ref, curv_mask_ref,
     gdv_diag_ref, curv_diag_ref) = refs[1:8]
    layer_refs = refs[8:-1]                             # NUM_LAYERS * 11 VMEM refs
    out_ref = refs[-1]

    gdv_adj = gdv_adj_ref[...]                          # (N, N)
    curv_adj = curv_adj_ref[...]
    gdv_edge = gdv_mask_ref[...] > 0.0                  # (N, N) bool, incl. self loops
    curv_edge = curv_mask_ref[...] > 0.0
    gdv_diag = gdv_diag_ref[...]                        # (N, 1)
    curv_diag = curv_diag_ref[...]
    x = x_ref[...]                                      # (N, F)

    def gat(h_in, edge, w_ref, asrc_ref, adst_ref, b_ref):
        # h = x @ W  (no bias on the GAT linear, matching PyG default)
        h = jnp.dot(h_in, w_ref[...], preferred_element_type=jnp.float32)   # (N, H)
        # attention scalars as matmuls (MXU) -> (N, 1)
        a_src = jnp.dot(h, asrc_ref[...].T, preferred_element_type=jnp.float32)
        a_dst = jnp.dot(h, adst_ref[...].T, preferred_element_type=jnp.float32)
        # e[i, j] = LeakyReLU_0.2(a_src[j] + a_dst[i])  (i = dst, j = src)
        e = a_dst + a_src.T                                                  # (N, N)
        e = jnp.where(e > 0, e, 0.2 * e)
        # masked softmax over incoming edges (self-loops guarantee non-empty rows)
        e = jnp.where(edge, e, -1e30)
        m = jnp.max(e, axis=-1, keepdims=True)
        p = jnp.exp(e - m)
        s = jnp.sum(p, axis=-1, keepdims=True)
        attn = p * pl.reciprocal(s, approx=True)
        out = jnp.dot(attn, h, preferred_element_type=jnp.float32) + b_ref[...]
        # outer self.act = nn.LeakyReLU() (slope 0.01), fused here
        return jnp.where(out > 0, out, 0.01 * out)

    # TODO(synk): nn.Dropout(drop) is defined in __init__ but never applied in
    # the reference forward(), so it is intentionally omitted here.
    for i in range(NUM_LAYERS):
        (w1, asrc1, adst1, b1,
         w2, asrc2, adst2, b2,
         fw1, fw2, fb) = layer_refs[i * _PER_LAYER_REFS:(i + 1) * _PER_LAYER_REFS]
        eps_gdv = eps_ref[2 * i]
        eps_curv = eps_ref[2 * i + 1]

        # Transform: adj' has eps*adj_ii on the diagonal, off-diagonal unchanged
        #   adj' @ x == adj @ x + (eps - 1) * diag(adj)[:,None] * x
        xt1 = (jnp.dot(gdv_adj, x, preferred_element_type=jnp.float32)
               + (eps_gdv - 1.0) * gdv_diag * x)
        x1 = gat(xt1, gdv_edge, w1, asrc1, adst1, b1)

        xt2 = (jnp.dot(curv_adj, x, preferred_element_type=jnp.float32)
               + (eps_curv - 1.0) * curv_diag * x)
        x2 = gat(xt2, curv_edge, w2, asrc2, adst2, b2)

        # fc: Linear(2H -> H) on concat([x1, x2]) == x1 @ W[:H] + x2 @ W[H:] + b
        x = (jnp.dot(x1, fw1[...], preferred_element_type=jnp.float32)
             + jnp.dot(x2, fw2[...], preferred_element_type=jnp.float32)
             + fb[...])

    out_ref[...] = x


def dual_gat_forward(params, x, gdv_adj, curv_adj, gdv_mask, curv_mask):
    # host-side (cheap, XLA-fused) prep: eps vector + adjacency diagonals
    eps = jnp.concatenate(
        sum([[p["eps_gdv"], p["eps_curv"]] for p in params], [])
    )                                                     # (2*NUM_LAYERS,)
    gdv_diag = jnp.diagonal(gdv_adj)[:, None]             # (N, 1)
    curv_diag = jnp.diagonal(curv_adj)[:, None]           # (N, 1)

    flat_params = []
    for p in params:
        flat_params += [p["w1"], p["asrc1"], p["adst1"], p["b1"],
                        p["w2"], p["asrc2"], p["adst2"], p["b2"],
                        p["fw1"], p["fw2"], p["fb"]]

    n_vmem_inputs = 7 + len(flat_params)
    return pl.pallas_call(
        dualgat_kernel,
        out_shape=jax.ShapeDtypeStruct((x.shape[0], HID), jnp.float32),
        in_specs=[_smem()] + [_vmem()] * n_vmem_inputs,
        out_specs=_vmem(),
    )(eps, x, gdv_adj, curv_adj, gdv_mask, curv_mask, gdv_diag, curv_diag,
      *flat_params)


# ---------------- parameter construction (deterministic) ---------------------
def _glorot(key, shape):
    fan_in, fan_out = shape[0], shape[-1]
    lim = math.sqrt(6.0 / (fan_in + fan_out))
    return jax.random.uniform(key, shape, jnp.float32, -lim, lim)


def make_params(key):
    params = []
    for i in range(NUM_LAYERS):
        in_dim = IN_DIM if i == 0 else HID
        keys = jax.random.split(jax.random.fold_in(key, i), 10)
        layer = {
            # Transform eps: nn.init.constant_(eps, 0.21 / sqrt(1))
            "eps_gdv": jnp.full((1,), 0.21, jnp.float32),
            "eps_curv": jnp.full((1,), 0.21, jnp.float32),
            # convs_1 (gdv branch)
            "w1": _glorot(keys[0], (in_dim, HID)),
            "asrc1": _glorot(keys[1], (1, HID)),
            "adst1": _glorot(keys[2], (1, HID)),
            "b1": jnp.zeros((1, HID), jnp.float32),
            # convs_2 (curvature branch)
            "w2": _glorot(keys[3], (in_dim, HID)),
            "asrc2": _glorot(keys[4], (1, HID)),
            "adst2": _glorot(keys[5], (1, HID)),
            "b2": jnp.zeros((1, HID), jnp.float32),
            # fcs[i]: Linear(2H, H); stored transposed and split into two halves
            "fw1": _glorot(keys[6], (HID, HID)),
            "fw2": _glorot(keys[7], (HID, HID)),
            "fb": _glorot(keys[8], (1, HID)),
        }
        params.append(layer)
    return params


# ---------------- synthetic data -----------------------------------------------
def make_adj(key):
    k1, k2 = jax.random.split(key)
    raw = jax.random.uniform(k1, (N, N), dtype=jnp.float32)
    sym = (raw + raw.T) * 0.5
    eye = jnp.eye(N, dtype=jnp.float32)
    off = jnp.where(sym > 0.55, sym, 0.0) * (1.0 - eye)
    diag = jax.random.uniform(k2, (N,), dtype=jnp.float32) * eye
    return off + diag


def adj_to_mask(adj):
    eye = jnp.eye(N, dtype=jnp.float32)
    # edges from the adjacency plus a self loop on every node (add_self_loops=True)
    return jnp.where((adj != 0.0) | (eye > 0.0), 1.0, 0.0).astype(jnp.float32)


if __name__ == "__main__":
    root = jax.random.PRNGKey(0)
    k_x, k_gdv, k_curv, k_params = jax.random.split(root, 4)

    x = jax.random.normal(k_x, (N, IN_DIM), dtype=jnp.float32)
    gdv_adj = make_adj(k_gdv)          # data.gdv_mat   (dense)
    curv_adj = make_adj(k_curv)        # data.curvs     (dense)
    gdv_mask = adj_to_mask(gdv_adj)    # dense stand-in for data.gdv_edge_index
    curv_mask = adj_to_mask(curv_adj)  # dense stand-in for data.edge_index

    params = make_params(k_params)

    fwd = jax.jit(dual_gat_forward)
    out = fwd(params, x, gdv_adj, curv_adj, gdv_mask, curv_mask)
    jax.block_until_ready(out)
    assert out.shape == (N, HID) and out.dtype == jnp.float32
    print("KERNEL_OK")
</pallas_src>

<mosaic_0001>
module attributes {stable_mosaic.version = 11 : i64} {
  func.func @dualgat_kernel(%arg0: memref<4xf32, #tpu.memory_space<smem>>, %arg1: memref<32x16xf32, #tpu.memory_space<vmem>>, %arg2: memref<32x32xf32, #tpu.memory_space<vmem>>, %arg3: memref<32x32xf32, #tpu.memory_space<vmem>>, %arg4: memref<32x32xf32, #tpu.memory_space<vmem>>, %arg5: memref<32x32xf32, #tpu.memory_space<vmem>>, %arg6: memref<32x1xf32, #tpu.memory_space<vmem>>, %arg7: memref<32x1xf32, #tpu.memory_space<vmem>>, %arg8: memref<16x32xf32, #tpu.memory_space<vmem>>, %arg9: memref<1x32xf32, #tpu.memory_space<vmem>>, %arg10: memref<1x32xf32, #tpu.memory_space<vmem>>, %arg11: memref<1x32xf32, #tpu.memory_space<vmem>>, %arg12: memref<16x32xf32, #tpu.memory_space<vmem>>, %arg13: memref<1x32xf32, #tpu.memory_space<vmem>>, %arg14: memref<1x32xf32, #tpu.memory_space<vmem>>, %arg15: memref<1x32xf32, #tpu.memory_space<vmem>>, %arg16: memref<32x32xf32, #tpu.memory_space<vmem>>, %arg17: memref<32x32xf32, #tpu.memory_space<vmem>>, %arg18: memref<1x32xf32, #tpu.memory_space<vmem>>, %arg19: memref<32x32xf32, #tpu.memory_space<vmem>>, %arg20: memref<1x32xf32, #tpu.memory_space<vmem>>, %arg21: memref<1x32xf32, #tpu.memory_space<vmem>>, %arg22: memref<1x32xf32, #tpu.memory_space<vmem>>, %arg23: memref<32x32xf32, #tpu.memory_space<vmem>>, %arg24: memref<1x32xf32, #tpu.memory_space<vmem>>, %arg25: memref<1x32xf32, #tpu.memory_space<vmem>>, %arg26: memref<1x32xf32, #tpu.memory_space<vmem>>, %arg27: memref<32x32xf32, #tpu.memory_space<vmem>>, %arg28: memref<32x32xf32, #tpu.memory_space<vmem>>, %arg29: memref<1x32xf32, #tpu.memory_space<vmem>>, %arg30: memref<32x32xf32, #tpu.memory_space<vmem>>) attributes {dimension_semantics = [], scalar_prefetch = 0 : i64, scratch_operands = 0 : i64, tpu.core_type = #tpu.core_type<tc>} {
    %c0 = arith.constant 0 : index
    %c0_0 = arith.constant 0 : index
    %0 = vector.load %arg2[%c0, %c0_0] : memref<32x32xf32, #tpu.memory_space<vmem>>, vector<32x32xf32>
    %c0_1 = arith.constant 0 : index
    %c0_2 = arith.constant 0 : index
    %1 = vector.load %arg3[%c0_1, %c0_2] : memref<32x32xf32, #tpu.memory_space<vmem>>, vector<32x32xf32>
    %c0_3 = arith.constant 0 : index
    %c0_4 = arith.constant 0 : index
    %2 = vector.load %arg4[%c0_3, %c0_4] : memref<32x32xf32, #tpu.memory_space<vmem>>, vector<32x32xf32>
    %cst = arith.constant 0.000000e+00 : f32
    %3 = vector.broadcast %cst : f32 to vector<32x32xf32>
    %4 = arith.cmpf ogt, %2, %3 : vector<32x32xf32>
    %c0_5 = arith.constant 0 : index
    %c0_6 = arith.constant 0 : index
    %5 = vector.load %arg5[%c0_5, %c0_6] : memref<32x32xf32, #tpu.memory_space<vmem>>, vector<32x32xf32>
    %cst_7 = arith.constant 0.000000e+00 : f32
    %6 = vector.broadcast %cst_7 : f32 to vector<32x32xf32>
    %7 = arith.cmpf ogt, %5, %6 : vector<32x32xf32>
    %c0_8 = arith.constant 0 : index
    %c0_9 = arith.constant 0 : index
    %8 = vector.load %arg6[%c0_8, %c0_9] : memref<32x1xf32, #tpu.memory_space<vmem>>, vector<32x1xf32>
    %c0_10 = arith.constant 0 : index
    %c0_11 = arith.constant 0 : index
    %9 = vector.load %arg7[%c0_10, %c0_11] : memref<32x1xf32, #tpu.memory_space<vmem>>, vector<32x1xf32>
    %c0_12 = arith.constant 0 : index
    %c0_13 = arith.constant 0 : index
    %10 = vector.load %arg1[%c0_12, %c0_13] : memref<32x16xf32, #tpu.memory_space<vmem>>, vector<32x16xf32>
    %c0_14 = arith.constant 0 : index
    %11 = memref.load %arg0[%c0_14] : memref<4xf32, #tpu.memory_space<smem>>
    %c1 = arith.constant 1 : index
    %12 = memref.load %arg0[%c1] : memref<4xf32, #tpu.memory_space<smem>>
    %cst_15 = arith.constant dense<0.000000e+00> : vector<32x16xf32>
    %13 = tpu.matmul %0, %10, %cst_15 {dimension_numbers = #tpu.dot_dimension_numbers<[1], [0], [0], [1], [0, 0, 1, 1], [], []>} : vector<32x32xf32>, vector<32x16xf32>, vector<32x16xf32> -> vector<32x16xf32>
    %cst_16 = arith.constant 1.000000e+00 : f32
    %14 = arith.subf %11, %cst_16 : f32
    %15 = vector.broadcast %14 : f32 to vector<32x1xf32>
    %16 = arith.mulf %15, %8 : vector<32x1xf32>
    %17 = vector.broadcast %16 : vector<32x1xf32> to vector<32x16xf32>
    %18 = arith.mulf %17, %10 : vector<32x16xf32>
    %19 = arith.addf %13, %18 : vector<32x16xf32>
    %c0_17 = arith.constant 0 : index
    %c0_18 = arith.constant 0 : index
    %20 = vector.load %arg8[%c0_17, %c0_18] : memref<16x32xf32, #tpu.memory_space<vmem>>, vector<16x32xf32>
    %cst_19 = arith.constant dense<0.000000e+00> : vector<32x32xf32>
    %21 = tpu.matmul %19, %20, %cst_19 {dimension_numbers = #tpu.dot_dimension_numbers<[1], [0], [0], [1], [0, 0, 1, 1], [], []>} : vector<32x16xf32>, vector<16x32xf32>, vector<32x32xf32> -> vector<32x32xf32>
    %c0_20 = arith.constant 0 : index
    %c0_21 = arith.constant 0 : index
    %22 = vector.load %arg9[%c0_20, %c0_21] : memref<1x32xf32, #tpu.memory_space<vmem>>, vector<1x32xf32>
    %23 = tpu.transpose %22, [1, 0] : vector<1x32xf32> -> vector<32x1xf32>
    %cst_22 = arith.constant dense<0.000000e+00> : vector<32x1xf32>
    %24 = tpu.matmul %21, %23, %cst_22 {dimension_numbers = #tpu.dot_dimension_numbers<[1], [0], [0], [1], [0, 0, 1, 1], [], []>} : vector<32x32xf32>, vector<32x1xf32>, vector<32x1xf32> -> vector<32x1xf32>
    %c0_23 = arith.constant 0 : index
    %c0_24 = arith.constant 0 : index
    %25 = vector.load %arg10[%c0_23, %c0_24] : memref<1x32xf32, #tpu.memory_space<vmem>>, vector<1x32xf32>
    %26 = tpu.transpose %25, [1, 0] : vector<1x32xf32> -> vector<32x1xf32>
    %cst_25 = arith.constant dense<0.000000e+00> : vector<32x1xf32>
    %27 = tpu.matmul %21, %26, %cst_25 {dimension_numbers = #tpu.dot_dimension_numbers<[1], [0], [0], [1], [0, 0, 1, 1], [], []>} : vector<32x32xf32>, vector<32x1xf32>, vector<32x1xf32> -> vector<32x1xf32>
    %28 = tpu.transpose %24, [1, 0] : vector<32x1xf32> -> vector<1x32xf32>
    %29 = vector.broadcast %27 : vector<32x1xf32> to vector<32x32xf32>
    %30 = vector.broadcast %28 : vector<1x32xf32> to vector<32x32xf32>
    %31 = arith.addf %29, %30 : vector<32x32xf32>
    %cst_26 = arith.constant 0.000000e+00 : f32
    %32 = vector.broadcast %cst_26 : f32 to vector<32x32xf32>
    %33 = arith.cmpf ogt, %31, %32 : vector<32x32xf32>
    %cst_27 = arith.constant 2.000000e-01 : f32
    %34 = vector.broadcast %cst_27 : f32 to vector<32x32xf32>
    %35 = arith.mulf %34, %31 : vector<32x32xf32>
    %36 = arith.select %33, %31, %35 : vector<32x32xi1>, vector<32x32xf32>
    %cst_28 = arith.constant -1.000000e+30 : f32
    %37 = vector.broadcast %cst_28 : f32 to vector<32x32xf32>
    %38 = arith.select %4, %36, %37 : vector<32x32xi1>, vector<32x32xf32>
    %cst_29 = arith.constant dense<0xFF800000> : vector<32xf32>
    %39 = vector.multi_reduction <maximumf>, %38, %cst_29 [1] : vector<32x32xf32> to vector<32xf32>
    %40 = vector.shape_cast %39 : vector<32xf32> to vector<32x1xf32>
    %41 = vector.broadcast %40 : vector<32x1xf32> to vector<32x32xf32>
    %42 = arith.subf %38, %41 : vector<32x32xf32>
    %43 = math.exp %42 : vector<32x32xf32>
    %cst_30 = arith.constant dense<0.000000e+00> : vector<32xf32>
    %44 = vector.multi_reduction <add>, %43, %cst_30 [1] : vector<32x32xf32> to vector<32xf32>
    %45 = vector.shape_cast %44 : vector<32xf32> to vector<32x1xf32>
    %46 = tpu.reciprocal %45 {approx = true} : vector<32x1xf32> -> vector<32x1xf32>
    %47 = vector.broadcast %46 : vector<32x1xf32> to vector<32x32xf32>
    %48 = arith.mulf %43, %47 : vector<32x32xf32>
    %cst_31 = arith.constant dense<0.000000e+00> : vector<32x32xf32>
    %49 = tpu.matmul %48, %21, %cst_31 {dimension_numbers = #tpu.dot_dimension_numbers<[1], [0], [0], [1], [0, 0, 1, 1], [], []>} : vector<32x32xf32>, vector<32x32xf32>, vector<32x32xf32> -> vector<32x32xf32>
    %c0_32 = arith.constant 0 : index
    %c0_33 = arith.constant 0 : index
    %50 = vector.load %arg11[%c0_32, %c0_33] : memref<1x32xf32, #tpu.memory_space<vmem>>, vector<1x32xf32>
    %51 = vector.broadcast %50 : vector<1x32xf32> to vector<32x32xf32>
    %52 = arith.addf %49, %51 : vector<32x32xf32>
    %cst_34 = arith.constant 0.000000e+00 : f32
    %53 = vector.broadcast %cst_34 : f32 to vector<32x32xf32>
    %54 = arith.cmpf ogt, %52, %53 : vector<32x32xf32>
    %cst_35 = arith.constant 0.00999999977 : f32
    %55 = vector.broadcast %cst_35 : f32 to vector<32x32xf32>
    %56 = arith.mulf %55, %52 : vector<32x32xf32>
    %57 = arith.select %54, %52, %56 : vector<32x32xi1>, vector<32x32xf32>
    %cst_36 = arith.constant dense<0.000000e+00> : vector<32x16xf32>
    %58 = tpu.matmul %1, %10, %cst_36 {dimension_numbers = #tpu.dot_dimension_numbers<[1], [0], [0], [1], [0, 0, 1, 1], [], []>} : vector<32x32xf32>, vector<32x16xf32>, vector<32x16xf32> -> vector<32x16xf32>
    %cst_37 = arith.constant 1.000000e+00 : f32
    %59 = arith.subf %12, %cst_37 : f32
    %60 = vector.broadcast %59 : f32 to vector<32x1xf32>
    %61 = arith.mulf %60, %9 : vector<32x1xf32>
    %62 = vector.broadcast %61 : vector<32x1xf32> to vector<32x16xf32>
    %63 = arith.mulf %62, %10 : vector<32x16xf32>
    %64 = arith.addf %58, %63 : vector<32x16xf32>
    %c0_38 = arith.constant 0 : index
    %c0_39 = arith.constant 0 : index
    %65 = vector.load %arg12[%c0_38, %c0_39] : memref<16x32xf32, #tpu.memory_space<vmem>>, vector<16x32xf32>
    %cst_40 = arith.constant dense<0.000000e+00> : vector<32x32xf32>
    %66 = tpu.matmul %64, %65, %cst_40 {dimension_numbers = #tpu.dot_dimension_numbers<[1], [0], [0], [1], [0, 0, 1, 1], [], []>} : vector<32x16xf32>, vector<16x32xf32>, vector<32x32xf32> -> vector<32x32xf32>
    %c0_41 = arith.constant 0 : index
    %c0_42 = arith.constant 0 : index
    %67 = vector.load %arg13[%c0_41, %c0_42] : memref<1x32xf32, #tpu.memory_space<vmem>>, vector<1x32xf32>
    %68 = tpu.transpose %67, [1, 0] : vector<1x32xf32> -> vector<32x1xf32>
    %cst_43 = arith.constant dense<0.000000e+00> : vector<32x1xf32>
    %69 = tpu.matmul %66, %68, %cst_43 {dimension_numbers = #tpu.dot_dimension_numbers<[1], [0], [0], [1], [0, 0, 1, 1], [], []>} : vector<32x32xf32>, vector<32x1xf32>, vector<32x1xf32> -> vector<32x1xf32>
    %c0_44 = arith.constant 0 : index
    %c0_45 = arith.constant 0 : index
    %70 = vector.load %arg14[%c0_44, %c0_45] : memref<1x32xf32, #tpu.memory_space<vmem>>, vector<1x32xf32>
    %71 = tpu.transpose %70, [1, 0] : vector<1x32xf32> -> vector<32x1xf32>
    %cst_46 = arith.constant dense<0.000000e+00> : vector<32x1xf32>
    %72 = tpu.matmul %66, %71, %cst_46 {dimension_numbers = #tpu.dot_dimension_numbers<[1], [0], [0], [1], [0, 0, 1, 1], [], []>} : vector<32x32xf32>, vector<32x1xf32>, vector<32x1xf32> -> vector<32x1xf32>
    %73 = tpu.transpose %69, [1, 0] : vector<32x1xf32> -> vector<1x32xf32>
    %74 = vector.broadcast %72 : vector<32x1xf32> to vector<32x32xf32>
    %75 = vector.broadcast %73 : vector<1x32xf32> to vector<32x32xf32>
    %76 = arith.addf %74, %75 : vector<32x32xf32>
    %cst_47 = arith.constant 0.000000e+00 : f32
    %77 = vector.broadcast %cst_47 : f32 to vector<32x32xf32>
    %78 = arith.cmpf ogt, %76, %77 : vector<32x32xf32>
    %cst_48 = arith.constant 2.000000e-01 : f32
    %79 = vector.broadcast %cst_48 : f32 to vector<32x32xf32>
    %80 = arith.mulf %79, %76 : vector<32x32xf32>
    %81 = arith.select %78, %76, %80 : vector<32x32xi1>, vector<32x32xf32>
    %cst_49 = arith.constant -1.000000e+30 : f32
    %82 = vector.broadcast %cst_49 : f32 to vector<32x32xf32>
    %83 = arith.select %7, %81, %82 : vector<32x32xi1>, vector<32x32xf32>
    %cst_50 = arith.constant dense<0xFF800000> : vector<32xf32>
    %84 = vector.multi_reduction <maximumf>, %83, %cst_50 [1] : vector<32x32xf32> to vector<32xf32>
    %85 = vector.shape_cast %84 : vector<32xf32> to vector<32x1xf32>
    %86 = vector.broadcast %85 : vector<32x1xf32> to vector<32x32xf32>
    %87 = arith.subf %83, %86 : vector<32x32xf32>
    %88 = math.exp %87 : vector<32x32xf32>
    %cst_51 = arith.constant dense<0.000000e+00> : vector<32xf32>
    %89 = vector.multi_reduction <add>, %88, %cst_51 [1] : vector<32x32xf32> to vector<32xf32>
    %90 = vector.shape_cast %89 : vector<32xf32> to vector<32x1xf32>
    %91 = tpu.reciprocal %90 {approx = true} : vector<32x1xf32> -> vector<32x1xf32>
    %92 = vector.broadcast %91 : vector<32x1xf32> to vector<32x32xf32>
    %93 = arith.mulf %88, %92 : vector<32x32xf32>
    %cst_52 = arith.constant dense<0.000000e+00> : vector<32x32xf32>
    %94 = tpu.matmul %93, %66, %cst_52 {dimension_numbers = #tpu.dot_dimension_numbers<[1], [0], [0], [1], [0, 0, 1, 1], [], []>} : vector<32x32xf32>, vector<32x32xf32>, vector<32x32xf32> -> vector<32x32xf32>
    %c0_53 = arith.constant 0 : index
    %c0_54 = arith.constant 0 : index
    %95 = vector.load %arg15[%c0_53, %c0_54] : memref<1x32xf32, #tpu.memory_space<vmem>>, vector<1x32xf32>
    %96 = vector.broadcast %95 : vector<1x32xf32> to vector<32x32xf32>
    %97 = arith.addf %94, %96 : vector<32x32xf32>
    %cst_55 = arith.constant 0.000000e+00 : f32
    %98 = vector.broadcast %cst_55 : f32 to vector<32x32xf32>
    %99 = arith.cmpf ogt, %97, %98 : vector<32x32xf32>
    %cst_56 = arith.constant 0.00999999977 : f32
    %100 = vector.broadcast %cst_56 : f32 to vector<32x32xf32>
    %101 = arith.mulf %100, %97 : vector<32x32xf32>
    %102 = arith.select %99, %97, %101 : vector<32x32xi1>, vector<32x32xf32>
    %c0_57 = arith.constant 0 : index
    %c0_58 = arith.constant 0 : index
    %103 = vector.load %arg16[%c0_57, %c0_58] : memref<32x32xf32, #tpu.memory_space<vmem>>, vector<32x32xf32>
    %cst_59 = arith.constant dense<0.000000e+00> : vector<32x32xf32>
    %104 = tpu.matmul %57, %103, %cst_59 {dimension_numbers = #tpu.dot_dimension_numbers<[1], [0], [0], [1], [0, 0, 1, 1], [], []>} : vector<32x32xf32>, vector<32x32xf32>, vector<32x32xf32> -> vector<32x32xf32>
    %c0_60 = arith.constant 0 : index
    %c0_61 = arith.constant 0 : index
    %105 = vector.load %arg17[%c0_60, %c0_61] : memref<32x32xf32, #tpu.memory_space<vmem>>, vector<32x32xf32>
    %cst_62 = arith.constant dense<0.000000e+00> : vector<32x32xf32>
    %106 = tpu.matmul %102, %105, %cst_62 {dimension_numbers = #tpu.dot_dimension_numbers<[1], [0], [0], [1], [0, 0, 1, 1], [], []>} : vector<32x32xf32>, vector<32x32xf32>, vector<32x32xf32> -> vector<32x32xf32>
    %107 = arith.addf %104, %106 : vector<32x32xf32>
    %c0_63 = arith.constant 0 : index
    %c0_64 = arith.constant 0 : index
    %108 = vector.load %arg18[%c0_63, %c0_64] : memref<1x32xf32, #tpu.memory_space<vmem>>, vector<1x32xf32>
    %109 = vector.broadcast %108 : vector<1x32xf32> to vector<32x32xf32>
    %110 = arith.addf %107, %109 : vector<32x32xf32>
    %c2 = arith.constant 2 : index
    %111 = memref.load %arg0[%c2] : memref<4xf32, #tpu.memory_space<smem>>
    %c3 = arith.constant 3 : index
    %112 = memref.load %arg0[%c3] : memref<4xf32, #tpu.memory_space<smem>>
    %cst_65 = arith.constant dense<0.000000e+00> : vector<32x32xf32>
    %113 = tpu.matmul %0, %110, %cst_65 {dimension_numbers = #tpu.dot_dimension_numbers<[1], [0], [0], [1], [0, 0, 1, 1], [], []>} : vector<32x32xf32>, vector<32x32xf32>, vector<32x32xf32> -> vector<32x32xf32>
    %cst_66 = arith.constant 1.000000e+00 : f32
    %114 = arith.subf %111, %cst_66 : f32
    %115 = vector.broadcast %114 : f32 to vector<32x1xf32>
    %116 = arith.mulf %115, %8 : vector<32x1xf32>
    %117 = vector.broadcast %116 : vector<32x1xf32> to vector<32x32xf32>
    %118 = arith.mulf %117, %110 : vector<32x32xf32>
    %119 = arith.addf %113, %118 : vector<32x32xf32>
    %c0_67 = arith.constant 0 : index
    %c0_68 = arith.constant 0 : index
    %120 = vector.load %arg19[%c0_67, %c0_68] : memref<32x32xf32, #tpu.memory_space<vmem>>, vector<32x32xf32>
    %cst_69 = arith.constant dense<0.000000e+00> : vector<32x32xf32>
    %121 = tpu.matmul %119, %120, %cst_69 {dimension_numbers = #tpu.dot_dimension_numbers<[1], [0], [0], [1], [0, 0, 1, 1], [], []>} : vector<32x32xf32>, vector<32x32xf32>, vector<32x32xf32> -> vector<32x32xf32>
    %c0_70 = arith.constant 0 : index
    %c0_71 = arith.constant 0 : index
    %122 = vector.load %arg20[%c0_70, %c0_71] : memref<1x32xf32, #tpu.memory_space<vmem>>, vector<1x32xf32>
    %123 = tpu.transpose %122, [1, 0] : vector<1x32xf32> -> vector<32x1xf32>
    %cst_72 = arith.constant dense<0.000000e+00> : vector<32x1xf32>
    %124 = tpu.matmul %121, %123, %cst_72 {dimension_numbers = #tpu.dot_dimension_numbers<[1], [0], [0], [1], [0, 0, 1, 1], [], []>} : vector<32x32xf32>, vector<32x1xf32>, vector<32x1xf32> -> vector<32x1xf32>
    %c0_73 = arith.constant 0 : index
    %c0_74 = arith.constant 0 : index
    %125 = vector.load %arg21[%c0_73, %c0_74] : memref<1x32xf32, #tpu.memory_space<vmem>>, vector<1x32xf32>
    %126 = tpu.transpose %125, [1, 0] : vector<1x32xf32> -> vector<32x1xf32>
    %cst_75 = arith.constant dense<0.000000e+00> : vector<32x1xf32>
    %127 = tpu.matmul %121, %126, %cst_75 {dimension_numbers = #tpu.dot_dimension_numbers<[1], [0], [0], [1], [0, 0, 1, 1], [], []>} : vector<32x32xf32>, vector<32x1xf32>, vector<32x1xf32> -> vector<32x1xf32>
    %128 = tpu.transpose %124, [1, 0] : vector<32x1xf32> -> vector<1x32xf32>
    %129 = vector.broadcast %127 : vector<32x1xf32> to vector<32x32xf32>
    %130 = vector.broadcast %128 : vector<1x32xf32> to vector<32x32xf32>
    %131 = arith.addf %129, %130 : vector<32x32xf32>
    %cst_76 = arith.constant 0.000000e+00 : f32
    %132 = vector.broadcast %cst_76 : f32 to vector<32x32xf32>
    %133 = arith.cmpf ogt, %131, %132 : vector<32x32xf32>
    %cst_77 = arith.constant 2.000000e-01 : f32
    %134 = vector.broadcast %cst_77 : f32 to vector<32x32xf32>
    %135 = arith.mulf %134, %131 : vector<32x32xf32>
    %136 = arith.select %133, %131, %135 : vector<32x32xi1>, vector<32x32xf32>
    %cst_78 = arith.constant -1.000000e+30 : f32
    %137 = vector.broadcast %cst_78 : f32 to vector<32x32xf32>
    %138 = arith.select %4, %136, %137 : vector<32x32xi1>, vector<32x32xf32>
    %cst_79 = arith.constant dense<0xFF800000> : vector<32xf32>
    %139 = vector.multi_reduction <maximumf>, %138, %cst_79 [1] : vector<32x32xf32> to vector<32xf32>
    %140 = vector.shape_cast %139 : vector<32xf32> to vector<32x1xf32>
    %141 = vector.broadcast %140 : vector<32x1xf32> to vector<32x32xf32>
    %142 = arith.subf %138, %141 : vector<32x32xf32>
    %143 = math.exp %142 : vector<32x32xf32>
    %cst_80 = arith.constant dense<0.000000e+00> : vector<32xf32>
    %144 = vector.multi_reduction <add>, %143, %cst_80 [1] : vector<32x32xf32> to vector<32xf32>
    %145 = vector.shape_cast %144 : vector<32xf32> to vector<32x1xf32>
    %146 = tpu.reciprocal %145 {approx = true} : vector<32x1xf32> -> vector<32x1xf32>
    %147 = vector.broadcast %146 : vector<32x1xf32> to vector<32x32xf32>
    %148 = arith.mulf %143, %147 : vector<32x32xf32>
    %cst_81 = arith.constant dense<0.000000e+00> : vector<32x32xf32>
    %149 = tpu.matmul %148, %121, %cst_81 {dimension_numbers = #tpu.dot_dimension_numbers<[1], [0], [0], [1], [0, 0, 1, 1], [], []>} : vector<32x32xf32>, vector<32x32xf32>, vector<32x32xf32> -> vector<32x32xf32>
    %c0_82 = arith.constant 0 : index
    %c0_83 = arith.constant 0 : index
    %150 = vector.load %arg22[%c0_82, %c0_83] : memref<1x32xf32, #tpu.memory_space<vmem>>, vector<1x32xf32>
    %151 = vector.broadcast %150 : vector<1x32xf32> to vector<32x32xf32>
    %152 = arith.addf %149, %151 : vector<32x32xf32>
    %cst_84 = arith.constant 0.000000e+00 : f32
    %153 = vector.broadcast %cst_84 : f32 to vector<32x32xf32>
    %154 = arith.cmpf ogt, %152, %153 : vector<32x32xf32>
    %cst_85 = arith.constant 0.00999999977 : f32
    %155 = vector.broadcast %cst_85 : f32 to vector<32x32xf32>
    %156 = arith.mulf %155, %152 : vector<32x32xf32>
    %157 = arith.select %154, %152, %156 : vector<32x32xi1>, vector<32x32xf32>
    %cst_86 = arith.constant dense<0.000000e+00> : vector<32x32xf32>
    %158 = tpu.matmul %1, %110, %cst_86 {dimension_numbers = #tpu.dot_dimension_numbers<[1], [0], [0], [1], [0, 0, 1, 1], [], []>} : vector<32x32xf32>, vector<32x32xf32>, vector<32x32xf32> -> vector<32x32xf32>
    %cst_87 = arith.constant 1.000000e+00 : f32
    %159 = arith.subf %112, %cst_87 : f32
    %160 = vector.broadcast %159 : f32 to vector<32x1xf32>
    %161 = arith.mulf %160, %9 : vector<32x1xf32>
    %162 = vector.broadcast %161 : vector<32x1xf32> to vector<32x32xf32>
    %163 = arith.mulf %162, %110 : vector<32x32xf32>
    %164 = arith.addf %158, %163 : vector<32x32xf32>
    %c0_88 = arith.constant 0 : index
    %c0_89 = arith.constant 0 : index
    %165 = vector.load %arg23[%c0_88, %c0_89] : memref<32x32xf32, #tpu.memory_space<vmem>>, vector<32x32xf32>
    %cst_90 = arith.constant dense<0.000000e+00> : vector<32x32xf32>
    %166 = tpu.matmul %164, %165, %cst_90 {dimension_numbers = #tpu.dot_dimension_numbers<[1], [0], [0], [1], [0, 0, 1, 1], [], []>} : vector<32x32xf32>, vector<32x32xf32>, vector<32x32xf32> -> vector<32x32xf32>
    %c0_91 = arith.constant 0 : index
    %c0_92 = arith.constant 0 : index
    %167 = vector.load %arg24[%c0_91, %c0_92] : memref<1x32xf32, #tpu.memory_space<vmem>>, vector<1x32xf32>
    %168 = tpu.transpose %167, [1, 0] : vector<1x32xf32> -> vector<32x1xf32>
    %cst_93 = arith.constant dense<0.000000e+00> : vector<32x1xf32>
    %169 = tpu.matmul %166, %168, %cst_93 {dimension_numbers = #tpu.dot_dimension_numbers<[1], [0], [0], [1], [0, 0, 1, 1], [], []>} : vector<32x32xf32>, vector<32x1xf32>, vector<32x1xf32> -> vector<32x1xf32>
    %c0_94 = arith.constant 0 : index
    %c0_95 = arith.constant 0 : index
    %170 = vector.load %arg25[%c0_94, %c0_95] : memref<1x32xf32, #tpu.memory_space<vmem>>, vector<1x32xf32>
    %171 = tpu.transpose %170, [1, 0] : vector<1x32xf32> -> vector<32x1xf32>
    %cst_96 = arith.constant dense<0.000000e+00> : vector<32x1xf32>
    %172 = tpu.matmul %166, %171, %cst_96 {dimension_numbers = #tpu.dot_dimension_numbers<[1], [0], [0], [1], [0, 0, 1, 1], [], []>} : vector<32x32xf32>, vector<32x1xf32>, vector<32x1xf32> -> vector<32x1xf32>
    %173 = tpu.transpose %169, [1, 0] : vector<32x1xf32> -> vector<1x32xf32>
    %174 = vector.broadcast %172 : vector<32x1xf32> to vector<32x32xf32>
    %175 = vector.broadcast %173 : vector<1x32xf32> to vector<32x32xf32>
    %176 = arith.addf %174, %175 : vector<32x32xf32>
    %cst_97 = arith.constant 0.000000e+00 : f32
    %177 = vector.broadcast %cst_97 : f32 to vector<32x32xf32>
    %178 = arith.cmpf ogt, %176, %177 : vector<32x32xf32>
    %cst_98 = arith.constant 2.000000e-01 : f32
    %179 = vector.broadcast %cst_98 : f32 to vector<32x32xf32>
    %180 = arith.mulf %179, %176 : vector<32x32xf32>
    %181 = arith.select %178, %176, %180 : vector<32x32xi1>, vector<32x32xf32>
    %cst_99 = arith.constant -1.000000e+30 : f32
    %182 = vector.broadcast %cst_99 : f32 to vector<32x32xf32>
    %183 = arith.select %7, %181, %182 : vector<32x32xi1>, vector<32x32xf32>
    %cst_100 = arith.constant dense<0xFF800000> : vector<32xf32>
    %184 = vector.multi_reduction <maximumf>, %183, %cst_100 [1] : vector<32x32xf32> to vector<32xf32>
    %185 = vector.shape_cast %184 : vector<32xf32> to vector<32x1xf32>
    %186 = vector.broadcast %185 : vector<32x1xf32> to vector<32x32xf32>
    %187 = arith.subf %183, %186 : vector<32x32xf32>
    %188 = math.exp %187 : vector<32x32xf32>
    %cst_101 = arith.constant dense<0.000000e+00> : vector<32xf32>
    %189 = vector.multi_reduction <add>, %188, %cst_101 [1] : vector<32x32xf32> to vector<32xf32>
    %190 = vector.shape_cast %189 : vector<32xf32> to vector<32x1xf32>
    %191 = tpu.reciprocal %190 {approx = true} : vector<32x1xf32> -> vector<32x1xf32>
    %192 = vector.broadcast %191 : vector<32x1xf32> to vector<32x32xf32>
    %193 = arith.mulf %188, %192 : vector<32x32xf32>
    %cst_102 = arith.constant dense<0.000000e+00> : vector<32x32xf32>
    %194 = tpu.matmul %193, %166, %cst_102 {dimension_numbers = #tpu.dot_dimension_numbers<[1], [0], [0], [1], [0, 0, 1, 1], [], []>} : vector<32x32xf32>, vector<32x32xf32>, vector<32x32xf32> -> vector<32x32xf32>
    %c0_103 = arith.constant 0 : index
    %c0_104 = arith.constant 0 : index
    %195 = vector.load %arg26[%c0_103, %c0_104] : memref<1x32xf32, #tpu.memory_space<vmem>>, vector<1x32xf32>
    %196 = vector.broadcast %195 : vector<1x32xf32> to vector<32x32xf32>
    %197 = arith.addf %194, %196 : vector<32x32xf32>
    %cst_105 = arith.constant 0.000000e+00 : f32
    %198 = vector.broadcast %cst_105 : f32 to vector<32x32xf32>
    %199 = arith.cmpf ogt, %197, %198 : vector<32x32xf32>
    %cst_106 = arith.constant 0.00999999977 : f32
    %200 = vector.broadcast %cst_106 : f32 to vector<32x32xf32>
    %201 = arith.mulf %200, %197 : vector<32x32xf32>
    %202 = arith.select %199, %197, %201 : vector<32x32xi1>, vector<32x32xf32>
    %c0_107 = arith.constant 0 : index
    %c0_108 = arith.constant 0 : index
    %203 = vector.load %arg27[%c0_107, %c0_108] : memref<32x32xf32, #tpu.memory_space<vmem>>, vector<32x32xf32>
    %cst_109 = arith.constant dense<0.000000e+00> : vector<32x32xf32>
    %204 = tpu.matmul %157, %203, %cst_109 {dimension_numbers = #tpu.dot_dimension_numbers<[1], [0], [0], [1], [0, 0, 1, 1], [], []>} : vector<32x32xf32>, vector<32x32xf32>, vector<32x32xf32> -> vector<32x32xf32>
    %c0_110 = arith.constant 0 : index
    %c0_111 = arith.constant 0 : index
    %205 = vector.load %arg28[%c0_110, %c0_111] : memref<32x32xf32, #tpu.memory_space<vmem>>, vector<32x32xf32>
    %cst_112 = arith.constant dense<0.000000e+00> : vector<32x32xf32>
    %206 = tpu.matmul %202, %205, %cst_112 {dimension_numbers = #tpu.dot_dimension_numbers<[1], [0], [0], [1], [0, 0, 1, 1], [], []>} : vector<32x32xf32>, vector<32x32xf32>, vector<32x32xf32> -> vector<32x32xf32>
    %207 = arith.addf %204, %206 : vector<32x32xf32>
    %c0_113 = arith.constant 0 : index
    %c0_114 = arith.constant 0 : index
    %208 = vector.load %arg29[%c0_113, %c0_114] : memref<1x32xf32, #tpu.memory_space<vmem>>, vector<1x32xf32>
    %209 = vector.broadcast %208 : vector<1x32xf32> to vector<32x32xf32>
    %210 = arith.addf %207, %209 : vector<32x32xf32>
    %c0_115 = arith.constant 0 : index
    %c0_116 = arith.constant 0 : index
    %211 = vector.load %arg30[%c0_115, %c0_116] : memref<32x32xf32, #tpu.memory_space<vmem>>, vector<32x32xf32>
    tpu.vector_store %arg30[%c0_115, %c0_116], %210 {strides = array<i32>} : memref<32x32xf32, #tpu.memory_space<vmem>>, vector<32x32xf32>,
    return
  }
}

</mosaic_0001>

<bundles_post_ra>
// kernel: dual_gat_forward.1
= control target key start
LH: loop header
LB: loop body
LE: loop exit
PB: predicated region body
PF: predicated region fallthrough
CT: control target
= control target key end

     0   :  { %s3284_s6 = smov 1   ;;  %s3285_s10 = smov 2   ;;  %s3912_s0 = inlined_call_operand.smem [shape: u32[31], index: -1, kind: input, shape index: {}] }
   0x1   :  { %s3327_s5 = sld [smem:[%s3912_s0]]   ;;  %s3286_s14 = smov 3  }
   0x2   :  { %s3332_s9 = sld [smem:[%s3912_s0 + %s3284_s6]]   ;;  %s3287_s18 = smov 4  }
   0x3   :  { %s3337_s13 = sld [smem:[%s3912_s0 + %s3285_s10]]   ;;  %s3288_s22 = smov 5  }
   0x4   :  { %s3342_s17 = sld [smem:[%s3912_s0 + %s3286_s14]]   ;;  %s3289_s26 = smov 6  }
   0x5   :  { %s3347_s21 = sld [smem:[%s3912_s0 + %s3287_s18]]   ;;  %s3290_s30 = smov 7  }
   0x6   :  { %s3352_s25 = sld [smem:[%s3912_s0 + %s3288_s22]]   ;;  %s3291_s4 = smov 8  }
   0x7   :  { %s3357_s29 = sld [smem:[%s3912_s0 + %s3289_s26]]   ;;  %s3292_s10 = smov 9  }
   0x8   :  { %s3362_s3 = sld [smem:[%s3912_s0 + %s3290_s30]]   ;;  %s3293_s15 = smov 10  }
   0x9   :  { %s3367_s8 = sld [smem:[%s3912_s0 + %s3291_s4]]   ;;  %s3294_s20 = smov 11  }
   0xa   :  { %s3372_s14 = sld [smem:[%s3912_s0 + %s3292_s10]]   ;;  %s3295_s26 = smov 12  }
   0xb   :  { %s3377_s19 = sld [smem:[%s3912_s0 + %s3293_s15]]   ;;  %s3296_s1 = smov 13  }
   0xc   :  { %s3382_s24 = sld [smem:[%s3912_s0 + %s3294_s20]]   ;;  %s3297_s7 = smov 14  }
   0xd   :  { %s3387_s30 = sld [smem:[%s3912_s0 + %s3295_s26]]   ;;  %s3298_s15 = smov 15  }
   0xe   :  { %s3392_s6 = sld [smem:[%s3912_s0 + %s3296_s1]]   ;;  %s3299_s22 = smov 16  }
   0xf   :  { %s3397_s12 = sld [smem:[%s3912_s0 + %s3297_s7]]   ;;  %s3300_s28 = smov 17  }
  0x10   :  { %s3402_s20 = sld [smem:[%s3912_s0 + %s3298_s15]]   ;;  %s3301_s7 = smov 18  }
  0x11   :  { %s3407_s27 = sld [smem:[%s3912_s0 + %s3299_s22]]   ;;  %s3302_s15 = smov 19  }
  0x12   :  { %3917 = sst [smem:[#allocation8_spill]] %s3382_s24  ;;  %s3303_s22 = smov 20  }
  0x13   :  { %s3412_s4 = sld [smem:[%s3912_s0 + %s3300_s28]]   ;;  %s3304_s28 = smov 21  }
  0x14   :  { %s3417_s24 = sld [smem:[%s3912_s0 + %s3301_s7]]   ;;  %s3305_s7 = smov 22  }
  0x16   :  { %3918 = sst [smem:[#allocation9_spill]] %s3402_s20 }
  0x17   :  { %3919 = sst [smem:[#allocation10_spill]] %s3407_s27 }
  0x18   :  { %s3422_s20 = sld [smem:[%s3912_s0 + %s3302_s15]]   ;;  %s3306_s15 = smov 23  }
  0x19   :  { %3920 = sst [smem:[#allocation11_spill]] %s3412_s4 }
  0x1a   :  { %3921 = sst [smem:[#allocation12_spill]] %s3417_s24 }
  0x1b   :  { %s3427_s27 = sld [smem:[%s3912_s0 + %s3303_s22]]   ;;  %s3307_s22 = smov 24  }
  0x1c   :  { %s3432_s4 = sld [smem:[%s3912_s0 + %s3304_s28]]   ;;  %s3308_s28 = smov 25  }
  0x1d   :  { %s3437_s24 = sld [smem:[%s3912_s0 + %s3305_s7]]   ;;  %s3309_s7 = smov 26  }
  0x1e   :  { %3922 = sst [smem:[#allocation13_spill]] %s3422_s20 }
  0x1f   :  { %s3442_s20 = sld [smem:[%s3912_s0 + %s3306_s15]]   ;;  %s3310_s15 = smov 27  }
  0x21   :  { %3923 = sst [smem:[#allocation14_spill]] %s3427_s27 }
  0x22   :  { %3924 = sst [smem:[#allocation15_spill]] %s3432_s4 }
  0x23   :  { %3925 = sst [smem:[#allocation16_spill]] %s3437_s24 }
  0x24   :  { %s3447_s27 = sld [smem:[%s3912_s0 + %s3307_s22]]   ;;  %s3311_s22 = smov 28  }
  0x25   :  { %3926 = sst [smem:[#allocation17_spill]] %s3442_s20 }
  0x26   :  { %s3452_s4 = sld [smem:[%s3912_s0 + %s3308_s28]]   ;;  %s3312_s28 = smov 29  }
  0x27   :  { %s3457_s24 = sld [smem:[%s3912_s0 + %s3309_s7]]   ;;  %s3313_s7 = smov 30  }
  0x28   :  { %s3462_s20 = sld [smem:[%s3912_s0 + %s3310_s15]]  }
  0x2a   :  { %3927 = sst [smem:[#allocation18_spill]] %s3447_s27 }
  0x2b   :  { %s3467_s27 = sld [smem:[%s3912_s0 + %s3311_s22]]  }
  0x2c   :  { %3928 = sst [smem:[#allocation19_spill]] %s3452_s4 }
  0x2d   :  { %3929 = sst [smem:[#allocation20_spill]] %s3457_s24 }
  0x2e   :  { %s3472_s4 = sld [smem:[%s3912_s0 + %s3312_s28]]  }
  0x2f   :  { %s3477_s24 = sld [smem:[%s3912_s0 + %s3313_s7]]  }
  0x30   :  { %66 = vsyncpa [#allocation4], 0 }
  0x31   :  { %67 = vsyncpa [#allocation3], 0  ;;  %s74_s15 = sshll.u32 %s3327_s5, 4  ;;  %s75_s15 = int_to_ptr.vmem [resolvable:$true] %s74_s15 }
  0x32   :  { %s3246_s16 = scalar_lea.vmem %s75_s15, 16  ;;  %p3251_p1 = scmp.lt.s32.totalorder %s75_s15, %s75_s15 }
  0x33   :  { %p3247_p0 = scmp.ne.s32.totalorder %s75_s15, %s3246_s16  ;;  %p3252_p2 = scmp.lt.s32.totalorder %s3246_s16, %s3246_s16 }
  0x35   :  { %p3253_p3 = por %p3252_p2, %p3251_p1 }
  0x37   :  { %p3254_p4 = pnand %p3253_p3, %p3247_p0 }
  0x39   :  { %3257 = shalt.err (!%p3254_p4)
}
  0x3a   :  { %s3314_s18 = smov [#allocation2]  }
  0x3b   :  { %77 = dma.vmem_to_smem %s75_s15, 16, %s3314_s18, [#allocation4]  }
  0x3c   :  { %3280 = dma.done.wait [#allocation4], 16  }
  0x3d   :  { %3281 = vsyncadd [#allocation4], 4294967280 }
  0x3e   :  { %139 = sfence }
  0x3f   :  { %v3481_v0 = vld [vmem:[%s3332_s9] sm:$0xff]  ;;  %v3484_v1 = vld [vmem:[%s3332_s9 + $0x8] sm:$0xff]  ;;  %v3487_v2 = vld [vmem:[%s3332_s9 + $0x10] sm:$0xff]  ;;  %vm208_vm0 = vcmask 261120   ;;  %v3315_v6 = vmov 0   ;;  %s176_s0 = sld [smem:[#allocation2]] }
  0x40   :  { %v3016_v3 = vpack.c.bf16 %v3484_v1, %v3481_v0  ;;  %v3492_v4 = vld [vmem:[%s3332_s9 + $0x18] sm:$0xff]  ;;  %v3495_v5 = vld [vmem:[%s3337_s13] sm:$0xff]  ;;  %3180 = vset.pattern.permute.xlu0 %v3315_v6  ;;  %3181 = vset.pattern.permute.xlu1 %v3315_v6  ;;  %v3505_v9 = vld [vmem:[%s3357_s29 + $0x10] sm:$0xff]  ;;  %vm308_vm1 = vcmask 130048   ;;  %s2591_s9 = sld [smem:[#allocation2 + $0x1]]  ;;  %s3938_s23 = sld [smem:[#allocation17_spill]] }
  0x41   :  { %v3020_v7 = vpack.c.bf16 %v3492_v4, %v3487_v2  ;;  %2808 = vmatprep.mubr.msk.f32.mxu0 %vm208_vm0, %v3495_v5  ;;  %v3502_v8 = vld [vmem:[%s3357_s29] sm:$0xff]  ;;  %v3508_v10 = vld [vmem:[%s3337_s13 + $0x8] sm:$0xff]  ;;  %v3511_v11 = vld [vmem:[%s3337_s13 + $0x10] sm:$0xff]  ;;  %s3939_s26 = sld [smem:[#allocation18_spill]]  ;;  %s3940_s28 = sld [smem:[#allocation19_spill]] }
  0x42   :  { %3017 = vmatprep.subr.bf16.mxu0 %v3016_v3  ;;  %v3514_v13 = vld [vmem:[%s3357_s29 + $0x8] sm:$0xff]  ;;  %v3519_v16 = vld [vmem:[%s3357_s29 + $0x18] sm:$0xff]  ;;  %v306_v20 = vld [vmem:[%s3367_s8] sm:$0xff]  ;;  %s3931_s29 = sld [smem:[#allocation10_spill]]  ;;  %s3941_s1 = sld [smem:[#allocation20_spill]] }
  0x43   :  { %3019 = vmatpush3.bf16.msra.mxu0 %v3016_v3  ;;  %v3526_v17 = vld [vmem:[%s3337_s13 + $0x18] sm:$0xff]  ;;  %v307_v21 = vld [vmem:[%s3367_s8 + $0x8] sm:$0xff]  ;;  %v3543_v39 = vld [vmem:[%s3342_s17] sm:$0xff]  ;;  %s3933_s8 = sld [smem:[#allocation8_spill]] }
  0x44   :  { %3021 = vmatprep.subr.bf16.mxu0 %v3020_v7  ;;  %v3024_v22 = vpack.c.bf16 %v307_v21, %v306_v20  ;;  %v3546_v40 = vld [vmem:[%s3342_s17 + $0x8] sm:$0xff]  ;;  %v3549_v41 = vld [vmem:[%s3342_s17 + $0x10] sm:$0xff]  ;;  %v3558_v42 = vld [vmem:[%s3342_s17 + $0x18] sm:$0xff]  ;;  %s2633_s17 = sld [smem:[#allocation2 + $0x2]]  ;;  %s3942_s2 = sld [smem:[#allocation16_spill]] }
  0x45   :  { %s2592_s5 = sadd.f32 -1.0, %s176_s0  ;;  %v2601_v43 = vld [vmem:[%s3372_s14] ss:$0 sm:$0xff]  ;;  %v3575_v20 = vld [vmem:[%s3362_s3 + $0x18] sm:$0xff]  ;;  %s3934_s14 = sld [smem:[#allocation12_spill]] }
  0x46   :  { %v2602_v45 = vld [vmem:[%s3377_s19] ss:$0 sm:$0xff]  ;;  %s2608_s13 = sadd.f32 -1.0, %s2591_s9  ;;  %s3935_s19 = sld [smem:[#allocation13_spill]] }
  0x47   :  { %3023 = vmatpush3.bf16.msra.mxu0 %v3020_v7  ;;  %v179_v12 = vstv %s2592_s5 }
  0x48   :  { %v180_v14 = vmul.f32 %v179_v12, %v3502_v8  ;;  %v182_v15 = vmul.f32 %v179_v12, %v3505_v9  ;;  %v181_v18 = vmul.f32 %v179_v12, %v3514_v13  ;;  %v183_v19 = vmul.f32 %v179_v12, %v3519_v16  ;;  %3025 = vmatprep.subr.bf16.mxu0 %v3024_v22 }
  0x49   :  { %v3577_v21 = vstv %s2608_s13 }
  0x4a   :  { %2809 = vmatmul.mubr.msk.f32.vlgmr.msra.gmra.mrb[0].mxu0 %vm208_vm0, %v3508_v10  ;;  %186 = vperm.xlu0 %3180, %v180_v14  }
  0x4b   :  { %2811 = vmatprep.mubr.msk.f32.mxu0 %vm208_vm0, %v3511_v11  ;;  %196 = vperm.xlu1 %3181, %v182_v15  }
  0x4c   :  { %3027 = vmatpush3.bf16.msra.mxu0 %v3024_v22  ;;  %v673_v22 = vmul.f32 %v3577_v21, %v3575_v20 }
  0x4d   :  { %3037 = vmatprep.subr.bf16.mxu0 %v3016_v3 }
  0x4e   :  { %2812 = vmatmul.mubr.msk.f32.gmra.mrb[2].mxu0 %vm208_vm0, %v3526_v17  ;;  %191 = vperm.xlu0 %3180, %v181_v18  }
  0x4f   :  { %201 = vperm.xlu1 %3181, %v183_v19  }
  0xc9   :  { %v187_v23 = vpop.permute.xlu0 %186 }
  0xca   :  { %v197_v24 = vpop.permute.xlu1 %196  ;;  %v204_v27 = vmul.f32 %v187_v23, %v3481_v0 }
  0xcb   :  { %v206_v32 = vmul.f32 %v197_v24, %v3487_v2 }
  0xcd   :  { %v192_v25 = vpop.permute.xlu0 %191 }
  0xce   :  { %v202_v26 = vpop.permute.xlu1 %201  ;;  %v205_v29 = vmul.f32 %v192_v25, %v3484_v1  ;;  %v484_v25 = vlaneseq }
  0xcf   :  { %v207_v31 = vmul.f32 %v202_v26, %v3492_v4 }
 0x11d   :  { %v2810_v28 = vpop.f32.mrb[0].mxu0 }
 0x11e   :  { %v287_v30 = vpop.f32.mrb[1].mxu0  ;;  %v293_v34 = vadd.f32 %v2810_v28, %v205_v29 }
 0x11f   :  { %v288_v33 = vadd.f32 %v287_v30, %v204_v27  ;;  %v485_v27 = vshrl.u32 %v484_v25, 7 }
 0x121   :  { %v2813_v35 = vpop.f32.mrb[2].mxu0  ;;  %2818 = vmatprep.mubr.msk.f32.mxu0 %vm308_vm1, %v288_v33  ;;  %v3585_v29 = vsub.s32 0, %v485_v27  ;;  %v3589_v33 = vld [vmem:[%s3347_s21] sm:$0xff] }
 0x122   :  { %v303_v36 = vadd.f32 %v2813_v35, %v207_v31  ;;  %v297_v37 = vpop.f32.mrb[3].mxu0  ;;  %2819 = vmatmul.mubr.msk.f32.vlgmr.msra.gmra.mrb[4].mxu0 %vm308_vm1, %v293_v34  ;;  %v3592_v35 = vld [vmem:[%s3347_s21 + $0x8] sm:$0xff]  ;;  %vm152_vm2 = vcmp.gt.f32.partialorder %v3589_v33, 0.0 }
 0x123   :  { %v298_v38 = vadd.f32 %v297_v37, %v206_v32  ;;  %3039 = vmatpush3.bf16.msra.mxu0 %v3016_v3  ;;  %vm153_vm5 = vcmp.gt.f32.partialorder %v3592_v35, 0.0 }
 0x124   :  { %3041 = vmatprep.subr.bf16.mxu0 %v3020_v7 }
 0x125   :  { %2821 = vmatprep.mubr.msk.f32.mxu0 %vm308_vm1, %v298_v38 }
 0x126   :  { %2822 = vmatmul.mubr.msk.f32.gmra.mrb[6].mxu0 %vm308_vm1, %v303_v36 }
 0x127   :  { %3043 = vmatpush3.bf16.msra.mxu0 %v3020_v7  ;;  %2846 = vmatprep.mubr.msk.f32.mxu0 %vm208_vm0, %v3543_v39 }
 0x12a   :  { %2847 = vmatmul.mubr.msk.f32.vlgmr.msra.gmra.mrb[8].mxu0 %vm208_vm0, %v3546_v40 }
 0x12b   :  { %2849 = vmatprep.mubr.msk.f32.mxu0 %vm208_vm0, %v3549_v41 }
 0x12e   :  { %2850 = vmatmul.mubr.msk.f32.gmra.mrb[10].mxu0 %vm208_vm0, %v3558_v42 }
 0x1f5   :  { %v2820_v44 = vpop.f32.mrb[4].mxu0 }
 0x1f6   :  { %v387_v46 = vpop.f32.mrb[5].mxu0  ;;  %v414_v47 = vmul.f32 %v2820_v44, %v2601_v43  ;;  %v437_v63 = vmul.f32 %v2820_v44, %v2602_v45 }
 0x1f7   :  { %v3028_v48 = vpack.c.bf16 %v2820_v44, %v387_v46  ;;  %v413_v49 = vmul.f32 %v2601_v43, %v387_v46  ;;  %v436_v51 = vmul.f32 %v2602_v45, %v387_v46 }
 0x1f8   :  { %v420_v50 = vsel %vm208_vm0, %v414_v47, 0.0  ;;  %v443_v3 = vsel %vm208_vm0, %v437_v63, 0.0 }
 0x1f9   :  { %421 = vadd.xlane.f32.xlu1 %v420_v50  ;;  %v2823_v52 = vpop.f32.mrb[6].mxu0  ;;  %3029 = vmatprep.subr.bf16.mxu1 %v3028_v48  ;;  %v417_v53 = vsel %vm208_vm0, %v413_v49, 0.0  ;;  %v440_v57 = vsel %vm208_vm0, %v436_v51, 0.0  ;;  %v3599_v50 = vld [vmem:[%s3347_s21 + $0x10] sm:$0xff] }
 0x1fa   :  { %3031 = vmatpush3.bf16.msra.mxu1 %v3028_v48  ;;  %418 = vadd.xlane.f32.xlu0 %v417_v53  ;;  %v397_v54 = vpop.f32.mrb[7].mxu0  ;;  %v416_v60 = vmul.f32 %v2823_v52, %v2601_v43  ;;  %v439_v6 = vmul.f32 %v2823_v52, %v2602_v45  ;;  %vm154_vm7 = vcmp.gt.f32.partialorder %v3599_v50, 0.0 }
 0x1fb   :  { %v3032_v55 = vpack.c.bf16 %v2823_v52, %v397_v54  ;;  %v415_v56 = vmul.f32 %v2601_v43, %v397_v54  ;;  %v438_v58 = vmul.f32 %v2602_v45, %v397_v54 }
 0x1fc   :  { %v426_v62 = vsel %vm208_vm0, %v416_v60, 0.0  ;;  %v449_v7 = vsel %vm208_vm0, %v439_v6, 0.0 }
 0x1fd   :  { %441 = vadd.xlane.f32.xlu1 %v440_v57  ;;  %3033 = vmatprep.subr.bf16.mxu1 %v3032_v55  ;;  %v423_v59 = vsel %vm208_vm0, %v415_v56, 0.0  ;;  %v446_v61 = vsel %vm208_vm0, %v438_v58, 0.0  ;;  %v3572_v19 = vpop.f32.mrb[8].mxu0 }
 0x1fe   :  { %3035 = vmatpush3.bf16.msra.mxu1 %v3032_v55  ;;  %424 = vadd.xlane.f32.xlu0 %v423_v59  ;;  %v3581_v23 = vpop.f32.mrb[9].mxu0  ;;  %v3606_v55 = vld [vmem:[%s3347_s21 + $0x18] sm:$0xff]  ;;  %s2635_s21 = sadd.f32 -1.0, %s2633_s17 }
 0x1ff   :  { %vm155_vm9 = vcmp.gt.f32.partialorder %v3606_v55, 0.0 }
 0x201   :  { %447 = vadd.xlane.f32.xlu1 %v446_v61  ;;  %v3583_v24 = vpop.f32.mrb[10].mxu0 }
 0x202   :  { %427 = vadd.xlane.f32.xlu0 %v426_v62  ;;  %v3617_v62 = vld [vmem:[%s3362_s3] sm:$0xff] }
 0x203   :  { %v670_v63 = vmul.f32 %v3577_v21, %v3617_v62 }
 0x206   :  { %444 = vadd.xlane.f32.xlu0 %v443_v3  ;;  %v3622_v3 = vld [vmem:[%s3362_s3 + $0x8] sm:$0xff] }
 0x207   :  { %v671_v6 = vmul.f32 %v3577_v21, %v3622_v3 }
 0x20a   :  { %450 = vadd.xlane.f32.xlu0 %v449_v7 }
 0x286   :  { %v422_v14 = vpop.xlane.xlu1 %421 }
 0x287   :  { %v419_v12 = vpop.xlane.xlu0 %418 }
 0x288   :  { %452 = vxpose.xlu1.b32.start [1/4] (short) (narrow) %v419_v12, 8 }
 0x28a   :  { %v442_v26 = vpop.xlane.xlu1 %441 }
 0x28b   :  { %v425_v15 = vpop.xlane.xlu0 %424 }
 0x28c   :  { %453 = vxpose.xlu1.b32.cont [2/4] (short) (narrow) %v422_v14, 8 }
 0x28e   :  { %v448_v28 = vpop.xlane.xlu1 %447 }
 0x28f   :  { %v428_v18 = vpop.xlane.xlu0 %427 }
 0x290   :  { %454 = vxpose.xlu1.b32.cont [3/4] (short) (narrow) %v425_v15, 8 }
 0x293   :  { %v445_v30 = vpop.xlane.xlu0 %444 }
 0x294   :  { %455 = vxpose.xlu1.b32.end [4/4] (short) (narrow) %v428_v18, 8 }
 0x297   :  { %v451_v44 = vpop.xlane.xlu0 %450 }
 0x2b2   :  { %691 = vperm.xlu1 %3181, %v673_v22  }
 0x308   :  { %v468_v31 = vpop.trf.xlu1 }
 0x309   :  { %v487_v32 = vrot.slane %v468_v31, %v3585_v29 }
 0x30b   :  { %v488_v34 = vadd.f32 %v487_v32, %v442_v26  ;;  %v489_v36 = vadd.f32 %v487_v32, %v445_v30  ;;  %v490_v37 = vadd.f32 %v487_v32, %v448_v28  ;;  %v491_v48 = vadd.f32 %v487_v32, %v451_v44 }
 0x30d   :  { %vm492_vm3 = vcmp.gt.f32.partialorder %v488_v34, 0.0  ;;  %v496_v38 = vmul.f32 0.2, %v488_v34  ;;  %vm493_vm4 = vcmp.gt.f32.partialorder %v489_v36, 0.0  ;;  %v497_v43 = vmul.f32 0.2, %v489_v36 }
 0x30e   :  { %v498_v47 = vmul.f32 0.2, %v490_v37  ;;  %vm494_vm6 = vcmp.gt.f32.partialorder %v490_v37, 0.0  ;;  %v499_v54 = vmul.f32 0.2, %v491_v48  ;;  %vm495_vm8 = vcmp.gt.f32.partialorder %v491_v48, 0.0 }
 0x30f   :  { %v500_v45 = vsel %vm492_vm3, %v488_v34, %v496_v38  ;;  %v501_v46 = vsel %vm493_vm4, %v489_v36, %v497_v43 }
 0x310   :  { %v504_v49 = vsel %vm152_vm2, %v500_v45, -1e+30  ;;  %v505_v52 = vsel %vm153_vm5, %v501_v46, -1e+30  ;;  %v502_v53 = vsel %vm494_vm6, %v490_v37, %v498_v47  ;;  %v503_v58 = vsel %vm495_vm8, %v491_v48, %v499_v54  ;;  %v3631_v46 = vld [vmem:[%s3362_s3 + $0x10] sm:$0xff]  ;;  %v786_v48 = vpop.f32.mrb[11].mxu0 }
 0x311   :  { %v508_v51 = vsel %vm208_vm0, %v504_v49, -inf  ;;  %v511_v56 = vsel %vm208_vm0, %v505_v52, -inf  ;;  %v506_v57 = vsel %vm154_vm7, %v502_v53, -1e+30  ;;  %v507_v60 = vsel %vm155_vm9, %v503_v58, -1e+30 }
 0x312   :  { %509 = vmax.xlane.f32.xlu0 %v508_v51  ;;  %v514_v59 = vsel %vm208_vm0, %v506_v57, -inf  ;;  %v517_v61 = vsel %vm208_vm0, %v507_v60, -inf  ;;  %v672_v47 = vmul.f32 %v3577_v21, %v3631_v46  ;;  %v796_v51 = vld [vmem:[%s3387_s30 + $0x8] sm:$0xff]  ;;  %s3932_s3 = sld [smem:[#allocation9_spill]] }
 0x316   :  { %512 = vmax.xlane.f32.xlu0 %v511_v56 }
 0x31a   :  { %515 = vmax.xlane.f32.xlu0 %v514_v59 }
 0x31e   :  { %518 = vmax.xlane.f32.xlu0 %v517_v61 }
 0x334   :  { %676 = vperm.xlu0 %3180, %v670_v63  }
 0x338   :  { %681 = vperm.xlu0 %3180, %v671_v6  }
 0x39f   :  { %v510_v7 = vpop.xlane.xlu0 %509 }
 0x3a0   :  { %v520_v12 = vsub.f32 %v504_v49, %v510_v7  ;;  %v795_v49 = vld [vmem:[%s3387_s30] sm:$0xff]  ;;  %s3936_s30 = sld [smem:[#allocation14_spill]] }
 0x3a2   :  { %v524_v14 = vmul.f32 1.442695, %v520_v12 }
 0x3a3   :  { %v513_v15 = vpop.xlane.xlu0 %512 }
 0x3a4   :  { %3182 = vpow2.f32 %v524_v14  ;;  %v521_v18 = vsub.f32 %v505_v52, %v513_v15  ;;  %v3044_v52 = vpack.c.bf16 %v796_v51, %v795_v49 }
 0x3a6   :  { %v526_v22 = vmul.f32 1.442695, %v521_v18  ;;  %3045 = vmatprep.subr.bf16.mxu1 %v3044_v52 }
 0x3a7   :  { %v516_v25 = vpop.xlane.xlu0 %515 }
 0x3a8   :  { %3184 = vpow2.f32 %v526_v22  ;;  %v522_v26 = vsub.f32 %v506_v57, %v516_v25  ;;  %v692_v25 = vpop.permute.xlu1 %691 }
 0x3aa   :  { %v528_v27 = vmul.f32 1.442695, %v522_v26 }
 0x3ab   :  { %v519_v28 = vpop.xlane.xlu0 %518 }
 0x3ac   :  { %3186 = vpow2.f32 %v528_v27  ;;  %v523_v30 = vsub.f32 %v507_v60, %v519_v28  ;;  %v697_v28 = vmul.f32 %v692_v25, %v3492_v4  ;;  %v2617_v4 = vld [vmem:[%s3392_s6] ss:$0 sm:$0xff]  ;;  %s3937_s6 = sld [smem:[#allocation15_spill]] }
 0x3ae   :  { %v3183_v31 = vpop.eup %3182  ;;  %v530_v32 = vmul.f32 1.442695, %v523_v30 }
 0x3af   :  { %v532_v34 = vsel %vm208_vm0, %v3183_v31, 0.0 }
 0x3b0   :  { %3188 = vpow2.f32 %v530_v32  ;;  %533 = vadd.xlane.f32.xlu0 %v532_v34 }
 0x3b2   :  { %v3185_v36 = vpop.eup %3184 }
 0x3b3   :  { %v535_v37 = vsel %vm208_vm0, %v3185_v36, 0.0  ;;  %v677_v53 = vpop.permute.xlu0 %676 }
 0x3b4   :  { %536 = vadd.xlane.f32.xlu0 %v535_v37  ;;  %v694_v12 = vmul.f32 %v677_v53, %v3481_v0 }
 0x3b6   :  { %v3187_v38 = vpop.eup %3186  ;;  %v777_v26 = vadd.f32 %v3581_v23, %v694_v12 }
 0x3b7   :  { %v538_v43 = vsel %vm208_vm0, %v3187_v38, 0.0  ;;  %v682_v54 = vpop.permute.xlu0 %681 }
 0x3b8   :  { %539 = vadd.xlane.f32.xlu0 %v538_v43  ;;  %v695_v18 = vmul.f32 %v682_v54, %v3484_v1  ;;  %v792_v1 = vadd.f32 %v3583_v24, %v697_v28 }
 0x3ba   :  { %v3189_v44 = vpop.eup %3188  ;;  %v782_v0 = vadd.f32 %v3572_v19, %v695_v18 }
 0x3bb   :  { %v541_v45 = vsel %vm208_vm0, %v3189_v44, 0.0 }
 0x3bc   :  { %542 = vadd.xlane.f32.xlu0 %v541_v45 }
 0x3d2   :  { %686 = vperm.xlu0 %3180, %v672_v47  }
 0x43d   :  { %v534_v56 = vpop.xlane.xlu0 %533 }
 0x43e   :  { %3190 = vrcp.f32 %v534_v56 }
 0x441   :  { %v537_v57 = vpop.xlane.xlu0 %536 }
 0x442   :  { %3192 = vrcp.f32 %v537_v57 }
 0x445   :  { %v540_v58 = vpop.xlane.xlu0 %539 }
 0x446   :  { %3194 = vrcp.f32 %v540_v58 }
 0x448   :  { %v3191_v59 = vpop.eup %3190 }
 0x449   :  { %v543_v60 = vpop.xlane.xlu0 %542  ;;  %v548_v61 = vmul.f32 %v3191_v59, %v3183_v31 }
 0x44a   :  { %3196 = vrcp.f32 %v543_v60 }
 0x44b   :  { %2832 = vmatprep.mubr.msk.f32.mxu1 %vm208_vm0, %v548_v61 }
 0x44c   :  { %v3193_v21 = vpop.eup %3192 }
 0x44d   :  { %v549_v63 = vmul.f32 %v3193_v21, %v3185_v36 }
 0x44f   :  { %2833 = vmatmul.mubr.msk.f32.vlgmr.msra.gmra.mrb[0].mxu1 %vm208_vm0, %v549_v63 }
 0x450   :  { %v3195_v6 = vpop.eup %3194  ;;  %3047 = vmatpush3.bf16.msra.mxu1 %v3044_v52  ;;  %v2618_v52 = vld [vmem:[%s3397_s12] ss:$0 sm:$0xff]  ;;  %s2634_s12 = sld [smem:[#allocation2 + $0x3]] }
 0x451   :  { %v550_v7 = vmul.f32 %v3195_v6, %v3187_v38  ;;  %v687_v14 = vpop.permute.xlu0 %686 }
 0x452   :  { %v696_v27 = vmul.f32 %v687_v14, %v3487_v2  ;;  %v3670_v14 = vstv %s2635_s21 }
 0x453   :  { %2835 = vmatprep.mubr.msk.f32.mxu1 %vm208_vm0, %v550_v7 }
 0x454   :  { %v3197_v15 = vpop.eup %3196  ;;  %v787_v30 = vadd.f32 %v786_v48, %v696_v27 }
 0x455   :  { %v551_v22 = vmul.f32 %v3197_v15, %v3189_v44  ;;  %v1374_v15 = vmul.f32 %v3670_v14, %v3514_v13 }
 0x456   :  { %s2651_s22 = sadd.f32 -1.0, %s2634_s12 }
 0x457   :  { %2836 = vmatmul.mubr.msk.f32.gmra.mrb[2].mxu1 %vm208_vm0, %v551_v22 }
 0x458   :  { %2856 = vmatprep.mubr.msk.f32.mxu1 %vm308_vm1, %v777_v26 }
 0x45b   :  { %2857 = vmatmul.mubr.msk.f32.vlgmr.msra.gmra.mrb[4].mxu1 %vm308_vm1, %v782_v0  ;;  %v3676_v0 = vld [vmem:[%s3352_s25] sm:$0xff] }
 0x45c   :  { %2859 = vmatprep.mubr.msk.f32.mxu1 %vm308_vm1, %v787_v30  ;;  %vm160_vm10 = vcmp.gt.f32.partialorder %v3676_v0, 0.0 }
 0x45f   :  { %2860 = vmatmul.mubr.msk.f32.gmra.mrb[6].mxu1 %vm308_vm1, %v792_v1  ;;  %v3679_v1 = vld [vmem:[%s3352_s25 + $0x8] sm:$0xff] }
 0x460   :  { %vm161_vm13 = vcmp.gt.f32.partialorder %v3679_v1, 0.0 }
 0x522   :  { %v3652_v23 = vpop.f32.mrb[0].mxu1 }
 0x523   :  { %v3654_v2 = vpop.f32.mrb[1].mxu1 }
 0x52a   :  { %v3656_v31 = vpop.f32.mrb[2].mxu1 }
 0x52b   :  { %v3658_v32 = vpop.f32.mrb[3].mxu1 }
 0x52e   :  { %v2858_v34 = vpop.f32.mrb[4].mxu1 }
 0x52f   :  { %v875_v19 = vpop.f32.mrb[5].mxu1  ;;  %v902_v36 = vmul.f32 %v2858_v34, %v2617_v4  ;;  %v925_v57 = vmul.f32 %v2858_v34, %v2618_v52 }
 0x530   :  { %v3048_v37 = vpack.c.bf16 %v2858_v34, %v875_v19  ;;  %v901_v38 = vmul.f32 %v2617_v4, %v875_v19  ;;  %v924_v54 = vmul.f32 %v2618_v52, %v875_v19 }
 0x531   :  { %v908_v43 = vsel %vm208_vm0, %v902_v36, 0.0  ;;  %v931_v58 = vsel %vm208_vm0, %v925_v57, 0.0 }
 0x532   :  { %909 = vadd.xlane.f32.xlu1 %v908_v43  ;;  %v2861_v24 = vpop.f32.mrb[6].mxu1  ;;  %3049 = vmatprep.subr.bf16.mxu0 %v3048_v37  ;;  %v905_v44 = vsel %vm208_vm0, %v901_v38, 0.0  ;;  %v928_v56 = vsel %vm208_vm0, %v924_v54, 0.0 }
 0x533   :  { %3051 = vmatpush3.bf16.msra.mxu0 %v3048_v37  ;;  %906 = vadd.xlane.f32.xlu0 %v905_v44  ;;  %v885_v45 = vpop.f32.mrb[7].mxu1  ;;  %v904_v51 = vmul.f32 %v2861_v24, %v2617_v4  ;;  %v927_v59 = vmul.f32 %v2861_v24, %v2618_v52  ;;  %v3686_v44 = vld [vmem:[%s3352_s25 + $0x10] sm:$0xff] }
 0x534   :  { %v3052_v47 = vpack.c.bf16 %v2861_v24, %v885_v45  ;;  %v903_v48 = vmul.f32 %v2617_v4, %v885_v45  ;;  %v926_v61 = vmul.f32 %v2618_v52, %v885_v45  ;;  %vm162_vm15 = vcmp.gt.f32.partialorder %v3686_v44, 0.0 }
 0x535   :  { %v914_v53 = vsel %vm208_vm0, %v904_v51, 0.0  ;;  %v937_v60 = vsel %vm208_vm0, %v927_v59, 0.0  ;;  %v3693_v51 = vld [vmem:[%s3352_s25 + $0x18] sm:$0xff]  ;;  %s3930_s25 = sld [smem:[#allocation11_spill]] }
 0x536   :  { %3053 = vmatprep.subr.bf16.mxu0 %v3052_v47  ;;  %v911_v49 = vsel %vm208_vm0, %v903_v48, 0.0  ;;  %v934_v21 = vsel %vm208_vm0, %v926_v61, 0.0  ;;  %vm163_vm3 = vcmp.gt.f32.partialorder %v3693_v51, 0.0 }
 0x537   :  { %3055 = vmatpush3.bf16.msra.mxu0 %v3052_v47  ;;  %912 = vadd.xlane.f32.xlu0 %v911_v49 }
 0x53b   :  { %915 = vadd.xlane.f32.xlu0 %v914_v53 }
 0x53f   :  { %929 = vadd.xlane.f32.xlu0 %v928_v56 }
 0x543   :  { %932 = vadd.xlane.f32.xlu0 %v931_v58 }
 0x547   :  { %938 = vadd.xlane.f32.xlu0 %v937_v60 }
 0x54b   :  { %935 = vadd.xlane.f32.xlu0 %v934_v21 }
 0x5bf   :  { %v910_v6 = vpop.xlane.xlu1 %909 }
 0x5c0   :  { %v907_v63 = vpop.xlane.xlu0 %906 }
 0x5c1   :  { %940 = vxpose.xlu0.b32.start [1/4] (short) (narrow) %v907_v63, 8 }
 0x5c4   :  { %v913_v7 = vpop.xlane.xlu0 %912 }
 0x5c5   :  { %941 = vxpose.xlu0.b32.cont [2/4] (short) (narrow) %v910_v6, 8 }
 0x5c8   :  { %v916_v12 = vpop.xlane.xlu0 %915 }
 0x5c9   :  { %942 = vxpose.xlu0.b32.cont [3/4] (short) (narrow) %v913_v7, 8 }
 0x5cc   :  { %v930_v18 = vpop.xlane.xlu0 %929 }
 0x5cd   :  { %943 = vxpose.xlu0.b32.end [4/4] (short) (narrow) %v916_v12, 8 }
 0x5d0   :  { %v933_v22 = vpop.xlane.xlu0 %932 }
 0x5d4   :  { %v939_v25 = vpop.xlane.xlu0 %938 }
 0x5d8   :  { %v936_v26 = vpop.xlane.xlu0 %935 }
 0x5f6   :  { %1384 = vperm.xlu0 %3180, %v1374_v15  }
 0x641   :  { %v956_v27 = vpop.trf.xlu0 }
 0x642   :  { %v975_v28 = vrot.slane %v956_v27, %v3585_v29 }
 0x644   :  { %v976_v30 = vadd.f32 %v975_v28, %v930_v18  ;;  %v977_v4 = vadd.f32 %v975_v28, %v933_v22  ;;  %v978_v34 = vadd.f32 %v975_v28, %v936_v26  ;;  %v979_v43 = vadd.f32 %v975_v28, %v939_v25 }
 0x646   :  { %vm980_vm11 = vcmp.gt.f32.partialorder %v976_v30, 0.0  ;;  %v984_v13 = vmul.f32 0.2, %v976_v30  ;;  %vm981_vm12 = vcmp.gt.f32.partialorder %v977_v4, 0.0  ;;  %v985_v19 = vmul.f32 0.2, %v977_v4 }
 0x647   :  { %v986_v38 = vmul.f32 0.2, %v978_v34  ;;  %vm982_vm14 = vcmp.gt.f32.partialorder %v978_v34, 0.0  ;;  %v987_v49 = vmul.f32 0.2, %v979_v43  ;;  %vm983_vm1 = vcmp.gt.f32.partialorder %v979_v43, 0.0 }
 0x648   :  { %v988_v36 = vsel %vm980_vm11, %v976_v30, %v984_v13  ;;  %v989_v37 = vsel %vm981_vm12, %v977_v4, %v985_v19 }
 0x649   :  { %v992_v24 = vsel %vm160_vm10, %v988_v36, -1e+30  ;;  %v993_v47 = vsel %vm161_vm13, %v989_v37, -1e+30  ;;  %v990_v48 = vsel %vm982_vm14, %v978_v34, %v986_v38  ;;  %v991_v54 = vsel %vm983_vm1, %v979_v43, %v987_v49 }
 0x64a   :  { %v996_v45 = vsel %vm208_vm0, %v992_v24, -inf  ;;  %v999_v52 = vsel %vm208_vm0, %v993_v47, -inf  ;;  %v994_v53 = vsel %vm162_vm15, %v990_v48, -1e+30  ;;  %v995_v57 = vsel %vm163_vm3, %v991_v54, -1e+30 }
 0x64b   :  { %997 = vmax.xlane.f32.xlu1 %v996_v45  ;;  %v1002_v56 = vsel %vm208_vm0, %v994_v53, -inf  ;;  %v1005_v58 = vsel %vm208_vm0, %v995_v57, -inf  ;;  %v1373_v36 = vmul.f32 %v3670_v14, %v3502_v8  ;;  %v1375_v37 = vmul.f32 %v3670_v14, %v3505_v9  ;;  %v1160_v54 = vld [vmem:[%s3930_s25] sm:$0xff] }
 0x64c   :  { %v1376_v38 = vmul.f32 %v3670_v14, %v3519_v16 }
 0x64f   :  { %1000 = vmax.xlane.f32.xlu1 %v999_v52 }
 0x653   :  { %1003 = vmax.xlane.f32.xlu1 %v1002_v56  ;;  %v1161_v56 = vld [vmem:[%s3930_s25 + $0x8] sm:$0xff] }
 0x657   :  { %1006 = vmax.xlane.f32.xlu1 %v1005_v58  ;;  %v1162_v58 = vld [vmem:[%s3930_s25 + $0x10] sm:$0xff] }
 0x6d8   :  { %v998_v59 = vpop.xlane.xlu1 %997 }
 0x6d9   :  { %v1008_v60 = vsub.f32 %v992_v24, %v998_v59  ;;  %v1163_v59 = vld [vmem:[%s3930_s25 + $0x18] sm:$0xff] }
 0x6db   :  { %v1012_v61 = vmul.f32 1.442695, %v1008_v60  ;;  %v3060_v60 = vpack.c.bf16 %v1163_v59, %v1162_v58 }
 0x6dc   :  { %v1001_v21 = vpop.xlane.xlu1 %1000 }
 0x6dd   :  { %3198 = vpow2.f32 %v1012_v61  ;;  %v1009_v63 = vsub.f32 %v993_v47, %v1001_v21  ;;  %v1156_v61 = vld [vmem:[%s3931_s29] sm:$0xff]  ;;  %v1157_v21 = vld [vmem:[%s3931_s29 + $0x8] sm:$0xff] }
 0x6df   :  { %v1014_v6 = vmul.f32 1.442695, %v1009_v63  ;;  %v3064_v63 = vpack.c.bf16 %v1157_v21, %v1156_v61  ;;  %v1486_v21 = vld [vmem:[%s3935_s19] sm:$0xff] }
 0x6e0   :  { %v1004_v7 = vpop.xlane.xlu1 %1003 }
 0x6e1   :  { %3200 = vpow2.f32 %v1014_v6  ;;  %v1010_v12 = vsub.f32 %v994_v53, %v1004_v7  ;;  %v2619_v6 = vld [vmem:[%s3932_s3] ss:$0 sm:$0xff] }
 0x6e3   :  { %v1016_v15 = vmul.f32 1.442695, %v1010_v12 }
 0x6e4   :  { %v1007_v18 = vpop.xlane.xlu1 %1006 }
 0x6e5   :  { %3202 = vpow2.f32 %v1016_v15  ;;  %v1011_v22 = vsub.f32 %v995_v57, %v1007_v18  ;;  %v3056_v57 = vpack.c.bf16 %v1161_v56, %v1160_v54 }
 0x6e7   :  { %v3199_v25 = vpop.eup %3198  ;;  %v1018_v26 = vmul.f32 1.442695, %v1011_v22  ;;  %3057 = vmatprep.subr.bf16.mxu1 %v3056_v57  ;;  %v1158_v22 = vld [vmem:[%s3931_s29 + $0x10] sm:$0xff] }
 0x6e8   :  { %v1020_v27 = vsel %vm208_vm0, %v3199_v25, 0.0  ;;  %3059 = vmatpush3.bf16.msra.mxu1 %v3056_v57 }
 0x6e9   :  { %3204 = vpow2.f32 %v1018_v26  ;;  %1021 = vadd.xlane.f32.xlu1 %v1020_v27  ;;  %3061 = vmatprep.subr.bf16.mxu1 %v3060_v60  ;;  %v2603_v26 = vld [vmem:[%s3933_s8] ss:$0 sm:$0xff] }
 0x6eb   :  { %v3201_v28 = vpop.eup %3200 }
 0x6ec   :  { %v1023_v30 = vsel %vm208_vm0, %v3201_v28, 0.0  ;;  %3063 = vmatpush3.bf16.msra.mxu1 %v3060_v60 }
 0x6ed   :  { %1024 = vadd.xlane.f32.xlu1 %v1023_v30  ;;  %3065 = vmatprep.subr.bf16.mxu1 %v3064_v63 }
 0x6ef   :  { %v3203_v4 = vpop.eup %3202 }
 0x6f0   :  { %v1026_v34 = vsel %vm208_vm0, %v3203_v4, 0.0 }
 0x6f1   :  { %1027 = vadd.xlane.f32.xlu1 %v1026_v34 }
 0x6f3   :  { %v3205_v13 = vpop.eup %3204 }
 0x6f4   :  { %v1029_v19 = vsel %vm208_vm0, %v3205_v13, 0.0 }
 0x6f5   :  { %1030 = vadd.xlane.f32.xlu1 %v1029_v19 }
 0x706   :  { %1379 = vperm.xlu1 %3181, %v1373_v36  }
 0x70a   :  { %1389 = vperm.xlu1 %3181, %v1375_v37  }
 0x70e   :  { %1394 = vperm.xlu1 %3181, %v1376_v38   ;;  %v643_v38 = vadd.f32 %v3652_v23, %v2603_v26 }
 0x710   :  { %vm657_vm14 = vcmp.gt.f32.partialorder %v643_v38, 0.0 }
 0x776   :  { %v1022_v43 = vpop.xlane.xlu1 %1021 }
 0x777   :  { %3206 = vrcp.f32 %v1022_v43 }
 0x77a   :  { %v1025_v24 = vpop.xlane.xlu1 %1024 }
 0x77b   :  { %3208 = vrcp.f32 %v1025_v24 }
 0x77e   :  { %v1028_v45 = vpop.xlane.xlu1 %1027 }
 0x77f   :  { %3210 = vrcp.f32 %v1028_v45  ;;  %v648_v45 = vadd.f32 %v2603_v26, %v3658_v32 }
 0x781   :  { %v3207_v47 = vpop.eup %3206  ;;  %vm658_vm1 = vcmp.gt.f32.partialorder %v648_v45, 0.0 }
 0x782   :  { %v1031_v48 = vpop.xlane.xlu1 %1030  ;;  %v1036_v8 = vmul.f32 %v3207_v47, %v3199_v25  ;;  %v1159_v25 = vld [vmem:[%s3931_s29 + $0x18] sm:$0xff] }
 0x783   :  { %3212 = vrcp.f32 %v1031_v48  ;;  %v3068_v30 = vpack.c.bf16 %v1159_v25, %v1158_v22  ;;  %v661_v48 = vmul.f32 0.01, %v643_v38 }
 0x784   :  { %2870 = vmatprep.mubr.msk.f32.mxu0 %vm208_vm0, %v1036_v8  ;;  %v653_v8 = vadd.f32 %v3656_v31, %v2603_v26 }
 0x785   :  { %v3209_v9 = vpop.eup %3208  ;;  %v665_v32 = vsel %vm657_vm14, %v643_v38, %v661_v48 }
 0x786   :  { %v1037_v49 = vmul.f32 %v3209_v9, %v3201_v28  ;;  %v1380_v22 = vpop.permute.xlu1 %1379 }
 0x788   :  { %2871 = vmatmul.mubr.msk.f32.vlgmr.msra.gmra.mrb[12].mxu0 %vm208_vm0, %v1037_v49  ;;  %v662_v49 = vmul.f32 0.01, %v648_v45 }
 0x789   :  { %v3211_v16 = vpop.eup %3210 }
 0x78a   :  { %v1038_v14 = vmul.f32 %v3211_v16, %v3203_v4  ;;  %v638_v4 = vadd.f32 %v2603_v26, %v3654_v2  ;;  %v663_v16 = vmul.f32 0.01, %v653_v8  ;;  %v666_v31 = vsel %vm658_vm1, %v648_v45, %v662_v49  ;;  %v1390_v25 = vpop.permute.xlu1 %1389  ;;  %v1385_v26 = vpop.permute.xlu0 %1384 }
 0x78c   :  { %2873 = vmatprep.mubr.msk.f32.mxu0 %vm208_vm0, %v1038_v14  ;;  %v660_v43 = vmul.f32 0.01, %v638_v4  ;;  %vm656_vm12 = vcmp.gt.f32.partialorder %v638_v4, 0.0 }
 0x78d   :  { %v3213_v52 = vpop.eup %3212 }
 0x78e   :  { %v1039_v53 = vmul.f32 %v3213_v52, %v3205_v13  ;;  %v664_v23 = vsel %vm656_vm12, %v638_v4, %v660_v43  ;;  %v2632_v52 = vld [vmem:[%s3934_s14] ss:$0 sm:$0xff] }
 0x78f   :  { %v2644_v43 = vld [vmem:[%s3936_s30] ss:$0 sm:$0xff] }
 0x790   :  { %2874 = vmatmul.mubr.msk.f32.gmra.mrb[14].mxu0 %vm208_vm0, %v1039_v53 }
 0x791   :  { %2912 = vmatprep.mubr.msk.f32.mxu0 %vm208_vm0, %v3495_v5 }
 0x85b   :  { %v2872_v7 = vpop.f32.mrb[12].mxu0 }
 0x85c   :  { %v1131_v5 = vadd.f32 %v2872_v7, %v2619_v6  ;;  %v1125_v12 = vpop.f32.mrb[13].mxu0 }
 0x85d   :  { %v1126_v15 = vadd.f32 %v2619_v6, %v1125_v12  ;;  %v1488_v12 = vld [vmem:[%s3935_s19 + $0x10] sm:$0xff] }
 0x85e   :  { %v1149_v18 = vmul.f32 0.01, %v1131_v5  ;;  %vm1145_vm4 = vcmp.gt.f32.partialorder %v1131_v5, 0.0 }
 0x85f   :  { %vm1144_vm6 = vcmp.gt.f32.partialorder %v1126_v15, 0.0  ;;  %v1148_v27 = vmul.f32 0.01, %v1126_v15 }
 0x860   :  { %v1153_v34 = vsel %vm1145_vm4, %v1131_v5, %v1149_v18  ;;  %vm659_vm4 = vcmp.gt.f32.partialorder %v653_v8, 0.0 }
 0x861   :  { %v1152_v28 = vsel %vm1144_vm6, %v1126_v15, %v1148_v27  ;;  %v667_v14 = vsel %vm659_vm4, %v653_v8, %v663_v16  ;;  %v1489_v15 = vld [vmem:[%s3935_s19 + $0x18] sm:$0xff] }
 0x862   :  { %2884 = vmatprep.mubr.msk.f32.mxu1 %vm208_vm0, %v1152_v28  ;;  %v3084_v18 = vpack.c.bf16 %v1489_v15, %v1488_v12 }
 0x863   :  { %v2875_v13 = vpop.f32.mrb[14].mxu0  ;;  %2885 = vmatmul.mubr.msk.f32.vlgmr.msra.gmra.mrb[8].mxu1 %vm208_vm0, %v1153_v34 }
 0x864   :  { %v1141_v19 = vadd.f32 %v2875_v13, %v2619_v6  ;;  %v1135_v36 = vpop.f32.mrb[15].mxu0  ;;  %3067 = vmatpush3.bf16.msra.mxu1 %v3064_v63  ;;  %v1487_v63 = vld [vmem:[%s3935_s19 + $0x8] sm:$0xff]  ;;  %v1395_v13 = vpop.permute.xlu1 %1394 }
 0x865   :  { %v1136_v37 = vadd.f32 %v2619_v6, %v1135_v36  ;;  %3069 = vmatprep.subr.bf16.mxu1 %v3068_v30  ;;  %v3080_v5 = vpack.c.bf16 %v1487_v63, %v1486_v21 }
 0x866   :  { %v1151_v24 = vmul.f32 0.01, %v1141_v19  ;;  %vm1147_vm8 = vcmp.gt.f32.partialorder %v1141_v19, 0.0 }
 0x867   :  { %vm1146_vm11 = vcmp.gt.f32.partialorder %v1136_v37, 0.0  ;;  %v1150_v2 = vmul.f32 0.01, %v1136_v37 }
 0x868   :  { %3071 = vmatpush3.bf16.msra.mxu1 %v3068_v30  ;;  %v1155_v9 = vsel %vm1147_vm8, %v1141_v19, %v1151_v24 }
 0x869   :  { %v1154_v47 = vsel %vm1146_vm11, %v1136_v37, %v1150_v2 }
 0x86a   :  { %2887 = vmatprep.mubr.msk.f32.mxu1 %vm208_vm0, %v1154_v47  ;;  %v2645_v47 = vld [vmem:[%s3937_s6] ss:$0 sm:$0xff] }
 0x86b   :  { %2888 = vmatmul.mubr.msk.f32.gmra.mrb[10].mxu1 %vm208_vm0, %v1155_v9 }
 0x86c   :  { %2898 = vmatprep.mubr.msk.f32.mxu1 %vm208_vm0, %v664_v23 }
 0x86f   :  { %2899 = vmatmul.mubr.msk.f32.vlgmr.msra.gmra.mrb[8].mxu1 %vm208_vm0, %v665_v32 }
 0x870   :  { %2901 = vmatprep.mubr.msk.f32.mxu1 %vm208_vm0, %v666_v31 }
 0x873   :  { %2902 = vmatmul.mubr.msk.f32.gmra.mrb[10].mxu1 %vm208_vm0, %v667_v14 }
 0x942   :  { %v2900_v53 = vpop.f32.mrb[8].mxu1 }
 0x943   :  { %v3742_v54 = vadd.f32 %v2900_v53, %v2632_v52  ;;  %v1339_v56 = vpop.f32.mrb[9].mxu1 }
 0x944   :  { %v3744_v57 = vadd.f32 %v2632_v52, %v1339_v56 }
 0x945   :  { %v1398_v30 = vmul.f32 %v1385_v26, %v3742_v54 }
 0x946   :  { %v3072_v58 = vpack.c.bf16 %v3742_v54, %v3744_v57  ;;  %v2903_v59 = vpop.f32.mrb[10].mxu1  ;;  %v1397_v28 = vmul.f32 %v1380_v22, %v3744_v57 }
 0x947   :  { %v3748_v60 = vadd.f32 %v2903_v59, %v2632_v52  ;;  %v1349_v61 = vpop.f32.mrb[11].mxu1 }
 0x948   :  { %v3752_v6 = vadd.f32 %v2632_v52, %v1349_v61  ;;  %3073 = vmatprep.subr.bf16.mxu0 %v3072_v58 }
 0x949   :  { %3075 = vmatpush3.bf16.msra.mxu0 %v3072_v58 }
 0x94a   :  { %v3076_v7 = vpack.c.bf16 %v3748_v60, %v3752_v6 }
 0x94c   :  { %3077 = vmatprep.subr.bf16.mxu0 %v3076_v7 }
 0x94d   :  { %3079 = vmatpush3.bf16.msra.mxu0 %v3076_v7 }
 0x94e   :  { %3081 = vmatprep.subr.bf16.mxu0 %v3080_v5 }
 0x950   :  { %2913 = vmatmul.mubr.msk.f32.vlgmr.msra.gmra.mrb[16].mxu0 %vm208_vm0, %v3508_v10 }
 0x951   :  { %3083 = vmatpush3.bf16.msra.mxu0 %v3080_v5  ;;  %2915 = vmatprep.mubr.msk.f32.mxu0 %vm208_vm0, %v3511_v11  ;;  %v1399_v11 = vmul.f32 %v1390_v25, %v3752_v6 }
 0x952   :  { %3085 = vmatprep.subr.bf16.mxu0 %v3084_v18 }
 0x954   :  { %2916 = vmatmul.mubr.msk.f32.gmra.mrb[18].mxu0 %vm208_vm0, %v3526_v17  ;;  %v1400_v17 = vmul.f32 %v1395_v13, %v3748_v60 }
 0x955   :  { %3087 = vmatpush3.bf16.msra.mxu0 %v3084_v18  ;;  %v3792_v18 = vstv %s2651_s22 }
 0x956   :  { %3097 = vmatprep.subr.bf16.mxu0 %v3072_v58  ;;  %v1854_v22 = vmul.f32 %v3792_v18, %v3575_v20  ;;  %v1851_v35 = vmul.f32 %v3792_v18, %v3617_v62 }
 0xa23   :  { %v2914_v27 = vpop.f32.mrb[16].mxu0 }
 0xa24   :  { %v1467_v4 = vpop.f32.mrb[17].mxu0  ;;  %v1473_v34 = vadd.f32 %v2914_v27, %v1398_v30 }
 0xa25   :  { %v1468_v10 = vadd.f32 %v1467_v4, %v1397_v28 }
 0xa27   :  { %v2917_v19 = vpop.f32.mrb[18].mxu0  ;;  %2926 = vmatprep.mubr.msk.f32.mxu0 %vm208_vm0, %v1468_v10 }
 0xa28   :  { %v1477_v36 = vpop.f32.mrb[19].mxu0  ;;  %2927 = vmatmul.mubr.msk.f32.vlgmr.msra.gmra.mrb[20].mxu0 %vm208_vm0, %v1473_v34  ;;  %v1483_v38 = vadd.f32 %v2917_v19, %v1400_v17 }
 0xa29   :  { %v1478_v37 = vadd.f32 %v1477_v36, %v1399_v11  ;;  %3099 = vmatpush3.bf16.msra.mxu0 %v3072_v58 }
 0xa2a   :  { %3101 = vmatprep.subr.bf16.mxu0 %v3076_v7 }
 0xa2b   :  { %2929 = vmatprep.mubr.msk.f32.mxu0 %vm208_vm0, %v1478_v37 }
 0xa2c   :  { %2930 = vmatmul.mubr.msk.f32.gmra.mrb[22].mxu0 %vm208_vm0, %v1483_v38 }
 0xa2d   :  { %3103 = vmatpush3.bf16.msra.mxu0 %v3076_v7  ;;  %2954 = vmatprep.mubr.msk.f32.mxu0 %vm208_vm0, %v3543_v39 }
 0xa30   :  { %2955 = vmatmul.mubr.msk.f32.vlgmr.msra.gmra.mrb[24].mxu0 %vm208_vm0, %v3546_v40 }
 0xa31   :  { %2957 = vmatprep.mubr.msk.f32.mxu0 %vm208_vm0, %v3549_v41 }
 0xa34   :  { %2958 = vmatmul.mubr.msk.f32.gmra.mrb[26].mxu0 %vm208_vm0, %v3558_v42 }
 0xafb   :  { %v2928_v24 = vpop.f32.mrb[20].mxu0 }
 0xafc   :  { %v1568_v45 = vpop.f32.mrb[21].mxu0  ;;  %v1595_v2 = vmul.f32 %v2928_v24, %v2644_v43  ;;  %v1618_v52 = vmul.f32 %v2928_v24, %v2645_v47 }
 0xafd   :  { %v3088_v48 = vpack.c.bf16 %v2928_v24, %v1568_v45  ;;  %v1594_v8 = vmul.f32 %v2644_v43, %v1568_v45  ;;  %v1617_v49 = vmul.f32 %v2645_v47, %v1568_v45 }
 0xafe   :  { %v1601_v9 = vsel %vm208_vm0, %v1595_v2, 0.0  ;;  %v1624_v53 = vsel %vm208_vm0, %v1618_v52, 0.0 }
 0xaff   :  { %1602 = vadd.xlane.f32.xlu0 %v1601_v9  ;;  %v2931_v39 = vpop.f32.mrb[22].mxu0  ;;  %3089 = vmatprep.subr.bf16.mxu1 %v3088_v48  ;;  %v1598_v40 = vsel %vm208_vm0, %v1594_v8, 0.0  ;;  %v1621_v42 = vsel %vm208_vm0, %v1617_v49, 0.0  ;;  %v1852_v49 = vmul.f32 %v3792_v18, %v3622_v3 }
 0xb00   :  { %3091 = vmatpush3.bf16.msra.mxu1 %v3088_v48  ;;  %1599 = vadd.xlane.f32.xlu1 %v1598_v40  ;;  %v1578_v41 = vpop.f32.mrb[23].mxu0  ;;  %v1597_v32 = vmul.f32 %v2931_v39, %v2644_v43  ;;  %v1620_v56 = vmul.f32 %v2931_v39, %v2645_v47 }
 0xb01   :  { %v3092_v23 = vpack.c.bf16 %v2931_v39, %v1578_v41  ;;  %v1596_v31 = vmul.f32 %v2644_v43, %v1578_v41  ;;  %v1619_v59 = vmul.f32 %v2645_v47, %v1578_v41 }
 0xb02   :  { %v1607_v16 = vsel %vm208_vm0, %v1597_v32, 0.0  ;;  %v1630_v58 = vsel %vm208_vm0, %v1620_v56, 0.0 }
 0xb03   :  { %3093 = vmatprep.subr.bf16.mxu1 %v3092_v23  ;;  %v1604_v14 = vsel %vm208_vm0, %v1596_v31, 0.0  ;;  %v1627_v61 = vsel %vm208_vm0, %v1619_v59, 0.0  ;;  %v3790_v15 = vpop.f32.mrb[24].mxu0 }
 0xb04   :  { %1622 = vadd.xlane.f32.xlu1 %v1621_v42  ;;  %3095 = vmatpush3.bf16.msra.mxu1 %v3092_v23  ;;  %v3796_v25 = vpop.f32.mrb[25].mxu0 }
 0xb07   :  { %v3798_v26 = vpop.f32.mrb[26].mxu0 }
 0xb08   :  { %1608 = vadd.xlane.f32.xlu1 %v1607_v16 }
 0xb0c   :  { %1605 = vadd.xlane.f32.xlu1 %v1604_v14 }
 0xb10   :  { %1625 = vadd.xlane.f32.xlu1 %v1624_v53 }
 0xb14   :  { %1631 = vadd.xlane.f32.xlu1 %v1630_v58 }
 0xb18   :  { %1628 = vadd.xlane.f32.xlu1 %v1627_v61 }
 0xb8c   :  { %v1603_v63 = vpop.xlane.xlu0 %1602 }
 0xb8d   :  { %v1600_v21 = vpop.xlane.xlu1 %1599 }
 0xb8e   :  { %1633 = vxpose.xlu1.b32.start [1/4] (short) (narrow) %v1600_v21, 8 }
 0xb91   :  { %v1623_v7 = vpop.xlane.xlu1 %1622 }
 0xb92   :  { %1634 = vxpose.xlu1.b32.cont [2/4] (short) (narrow) %v1603_v63, 8 }
 0xb95   :  { %v1609_v5 = vpop.xlane.xlu1 %1608 }
 0xb99   :  { %v1606_v12 = vpop.xlane.xlu1 %1605 }
 0xb9a   :  { %1635 = vxpose.xlu1.b32.cont [3/4] (short) (narrow) %v1606_v12, 8  ;;  %v1964_v12 = vld [vmem:[%s3938_s23] sm:$0xff] }
 0xb9d   :  { %v1626_v27 = vpop.xlane.xlu1 %1625 }
 0xb9e   :  { %1636 = vxpose.xlu1.b32.end [4/4] (short) (narrow) %v1609_v5, 8  ;;  %v1853_v5 = vmul.f32 %v3792_v18, %v3631_v46  ;;  %v1966_v46 = vld [vmem:[%s3938_s23 + $0x10] sm:$0xff]  ;;  %v1967_v18 = vld [vmem:[%s3938_s23 + $0x18] sm:$0xff] }
 0xba1   :  { %v1632_v28 = vpop.xlane.xlu1 %1631 }
 0xba5   :  { %v1629_v30 = vpop.xlane.xlu1 %1628 }
 0xbbc   :  { %1872 = vperm.xlu1 %3181, %v1854_v22   ;;  %v1965_v22 = vld [vmem:[%s3938_s23 + $0x8] sm:$0xff] }
 0xc12   :  { %v1649_v4 = vpop.trf.xlu1 }
 0xc13   :  { %v1668_v10 = vrot.slane %v1649_v4, %v3585_v29 }
 0xc15   :  { %v1669_v34 = vadd.f32 %v1668_v10, %v1623_v7  ;;  %v1670_v13 = vadd.f32 %v1668_v10, %v1626_v27  ;;  %v1671_v19 = vadd.f32 %v1668_v10, %v1629_v30  ;;  %v1672_v38 = vadd.f32 %v1668_v10, %v1632_v28  ;;  %v1955_v28 = vpop.f32.mrb[27].mxu0 }
 0xc16   :  { %v3104_v27 = vpack.c.bf16 %v1965_v22, %v1964_v12 }
 0xc17   :  { %vm1673_vm6 = vcmp.gt.f32.partialorder %v1669_v34, 0.0  ;;  %v1677_v11 = vmul.f32 0.2, %v1669_v34  ;;  %vm1674_vm8 = vcmp.gt.f32.partialorder %v1670_v13, 0.0  ;;  %v1678_v17 = vmul.f32 0.2, %v1670_v13 }
 0xc18   :  { %v1679_v37 = vmul.f32 0.2, %v1671_v19  ;;  %vm1675_vm11 = vcmp.gt.f32.partialorder %v1671_v19, 0.0  ;;  %v1680_v47 = vmul.f32 0.2, %v1672_v38  ;;  %vm1676_vm12 = vcmp.gt.f32.partialorder %v1672_v38, 0.0  ;;  %3105 = vmatprep.subr.bf16.mxu1 %v3104_v27 }
 0xc19   :  { %v1681_v36 = vsel %vm1673_vm6, %v1669_v34, %v1677_v11  ;;  %v1682_v20 = vsel %vm1674_vm8, %v1670_v13, %v1678_v17 }
 0xc1a   :  { %v1685_v43 = vsel %vm152_vm2, %v1681_v36, -1e+30  ;;  %v1686_v45 = vsel %vm153_vm5, %v1682_v20, -1e+30  ;;  %v1683_v2 = vsel %vm1675_vm11, %v1671_v19, %v1679_v37  ;;  %v1684_v9 = vsel %vm1676_vm12, %v1672_v38, %v1680_v47 }
 0xc1b   :  { %v1689_v24 = vsel %vm208_vm0, %v1685_v43, -inf  ;;  %v1692_v48 = vsel %vm208_vm0, %v1686_v45, -inf  ;;  %v1687_v8 = vsel %vm154_vm7, %v1683_v2, -1e+30  ;;  %v1688_v39 = vsel %vm155_vm9, %v1684_v9, -1e+30 }
 0xc1c   :  { %1690 = vmax.xlane.f32.xlu0 %v1689_v24  ;;  %v1695_v33 = vsel %vm208_vm0, %v1687_v8, -inf  ;;  %v1698_v40 = vsel %vm208_vm0, %v1688_v39, -inf  ;;  %v3108_v37 = vpack.c.bf16 %v1967_v18, %v1966_v46 }
 0xc20   :  { %1693 = vmax.xlane.f32.xlu0 %v1692_v48 }
 0xc24   :  { %1696 = vmax.xlane.f32.xlu0 %v1695_v33 }
 0xc28   :  { %1699 = vmax.xlane.f32.xlu0 %v1698_v40 }
 0xc3e   :  { %1857 = vperm.xlu0 %3180, %v1851_v35  }
 0xc42   :  { %1862 = vperm.xlu0 %3180, %v1852_v49  }
 0xca9   :  { %v1691_v50 = vpop.xlane.xlu0 %1690 }
 0xcaa   :  { %v1701_v41 = vsub.f32 %v1685_v43, %v1691_v50 }
 0xcac   :  { %v1705_v23 = vmul.f32 1.442695, %v1701_v41 }
 0xcad   :  { %v1694_v42 = vpop.xlane.xlu0 %1693 }
 0xcae   :  { %3214 = vpow2.f32 %v1705_v23  ;;  %v1702_v32 = vsub.f32 %v1686_v45, %v1694_v42 }
 0xcb0   :  { %v1707_v16 = vmul.f32 1.442695, %v1702_v32 }
 0xcb1   :  { %v1697_v55 = vpop.xlane.xlu0 %1696 }
 0xcb2   :  { %3216 = vpow2.f32 %v1707_v16  ;;  %v1703_v31 = vsub.f32 %v1687_v8, %v1697_v55  ;;  %v1873_v8 = vpop.permute.xlu1 %1872 }
 0xcb4   :  { %v1709_v14 = vmul.f32 1.442695, %v1703_v31 }
 0xcb5   :  { %v1700_v52 = vpop.xlane.xlu0 %1699 }
 0xcb6   :  { %3218 = vpow2.f32 %v1709_v14  ;;  %v1704_v53 = vsub.f32 %v1688_v39, %v1700_v52 }
 0xcb8   :  { %v3215_v62 = vpop.eup %3214  ;;  %v1711_v56 = vmul.f32 1.442695, %v1704_v53 }
 0xcb9   :  { %v1713_v3 = vsel %vm208_vm0, %v3215_v62, 0.0 }
 0xcba   :  { %3220 = vpow2.f32 %v1711_v56  ;;  %1714 = vadd.xlane.f32.xlu0 %v1713_v3 }
 0xcbc   :  { %v3217_v58 = vpop.eup %3216 }
 0xcbd   :  { %v1716_v59 = vsel %vm208_vm0, %v3217_v58, 0.0  ;;  %v1858_v30 = vpop.permute.xlu0 %1857 }
 0xcbe   :  { %1717 = vadd.xlane.f32.xlu0 %v1716_v59  ;;  %v1875_v24 = vmul.f32 %v1858_v30, %v3744_v57  ;;  %v1878_v57 = vmul.f32 %v1873_v8, %v3748_v60  ;;  %v2660_v60 = vld [vmem:[%s3939_s26] ss:$0 sm:$0xff] }
 0xcc0   :  { %v3219_v61 = vpop.eup %3218  ;;  %v1946_v9 = vadd.f32 %v3796_v25, %v1875_v24 }
 0xcc1   :  { %v1719_v21 = vsel %vm208_vm0, %v3219_v61, 0.0  ;;  %v1863_v4 = vpop.permute.xlu0 %1862 }
 0xcc2   :  { %1720 = vadd.xlane.f32.xlu0 %v1719_v21  ;;  %v1876_v47 = vmul.f32 %v1863_v4, %v3742_v54  ;;  %v1961_v54 = vadd.f32 %v3798_v26, %v1878_v57 }
 0xcc4   :  { %v3221_v63 = vpop.eup %3220  ;;  %v1951_v39 = vadd.f32 %v3790_v15, %v1876_v47 }
 0xcc5   :  { %v1722_v7 = vsel %vm208_vm0, %v3221_v63, 0.0 }
 0xcc6   :  { %1723 = vadd.xlane.f32.xlu0 %v1722_v7 }
 0xcdc   :  { %1867 = vperm.xlu0 %3180, %v1853_v5  }
 0xd47   :  { %v1715_v10 = vpop.xlane.xlu0 %1714 }
 0xd48   :  { %3222 = vrcp.f32 %v1715_v10 }
 0xd4b   :  { %v1718_v34 = vpop.xlane.xlu0 %1717 }
 0xd4c   :  { %3224 = vrcp.f32 %v1718_v34 }
 0xd4f   :  { %v1721_v13 = vpop.xlane.xlu0 %1720 }
 0xd50   :  { %3226 = vrcp.f32 %v1721_v13 }
 0xd52   :  { %v3223_v19 = vpop.eup %3222 }
 0xd53   :  { %v1724_v11 = vpop.xlane.xlu0 %1723  ;;  %v1729_v17 = vmul.f32 %v3223_v19, %v3215_v62  ;;  %v2661_v62 = vld [vmem:[%s3940_s28] ss:$0 sm:$0xff] }
 0xd54   :  { %3228 = vrcp.f32 %v1724_v11 }
 0xd55   :  { %2940 = vmatprep.mubr.msk.f32.mxu1 %vm208_vm0, %v1729_v17 }
 0xd56   :  { %v3225_v36 = vpop.eup %3224 }
 0xd57   :  { %v1730_v20 = vmul.f32 %v3225_v36, %v3217_v58 }
 0xd59   :  { %2941 = vmatmul.mubr.msk.f32.vlgmr.msra.gmra.mrb[12].mxu1 %vm208_vm0, %v1730_v20 }
 0xd5a   :  { %v3227_v38 = vpop.eup %3226  ;;  %3107 = vmatpush3.bf16.msra.mxu1 %v3104_v27 }
 0xd5b   :  { %v1731_v43 = vmul.f32 %v3227_v38, %v3219_v61  ;;  %3109 = vmatprep.subr.bf16.mxu1 %v3108_v37  ;;  %v1868_v45 = vpop.permute.xlu0 %1867 }
 0xd5c   :  { %v1877_v33 = vmul.f32 %v1868_v45, %v3752_v6 }
 0xd5d   :  { %2943 = vmatprep.mubr.msk.f32.mxu1 %vm208_vm0, %v1731_v43 }
 0xd5e   :  { %v3229_v2 = vpop.eup %3228  ;;  %3111 = vmatpush3.bf16.msra.mxu1 %v3108_v37  ;;  %v1956_v40 = vadd.f32 %v1955_v28, %v1877_v33 }
 0xd5f   :  { %v1732_v48 = vmul.f32 %v3229_v2, %v3221_v63 }
 0xd61   :  { %2944 = vmatmul.mubr.msk.f32.gmra.mrb[14].mxu1 %vm208_vm0, %v1732_v48 }
 0xd62   :  { %2968 = vmatprep.mubr.msk.f32.mxu1 %vm208_vm0, %v1946_v9 }
 0xd65   :  { %2969 = vmatmul.mubr.msk.f32.vlgmr.msra.gmra.mrb[16].mxu1 %vm208_vm0, %v1951_v39 }
 0xd66   :  { %2971 = vmatprep.mubr.msk.f32.mxu1 %vm208_vm0, %v1956_v40 }
 0xd69   :  { %2972 = vmatmul.mubr.msk.f32.gmra.mrb[18].mxu1 %vm208_vm0, %v1961_v54 }
 0xe2c   :  { %v3842_v25 = vpop.f32.mrb[12].mxu1 }
 0xe2d   :  { %v3844_v6 = vpop.f32.mrb[13].mxu1 }
 0xe34   :  { %v3846_v35 = vpop.f32.mrb[14].mxu1 }
 0xe35   :  { %v3848_v49 = vpop.f32.mrb[15].mxu1 }
 0xe38   :  { %v2970_v50 = vpop.f32.mrb[16].mxu1 }
 0xe39   :  { %v2046_v15 = vpop.f32.mrb[17].mxu1  ;;  %v2073_v41 = vmul.f32 %v2970_v50, %v2660_v60  ;;  %v2096_v59 = vmul.f32 %v2970_v50, %v2661_v62 }
 0xe3a   :  { %v3112_v23 = vpack.c.bf16 %v2970_v50, %v2046_v15  ;;  %v2072_v42 = vmul.f32 %v2660_v60, %v2046_v15  ;;  %v2095_v3 = vmul.f32 %v2661_v62, %v2046_v15 }
 0xe3b   :  { %v2079_v32 = vsel %vm208_vm0, %v2073_v41, 0.0  ;;  %v2102_v61 = vsel %vm208_vm0, %v2096_v59, 0.0 }
 0xe3c   :  { %2080 = vadd.xlane.f32.xlu1 %v2079_v32  ;;  %v2973_v26 = vpop.f32.mrb[18].mxu1  ;;  %3113 = vmatprep.subr.bf16.mxu0 %v3112_v23  ;;  %v2076_v16 = vsel %vm208_vm0, %v2072_v42, 0.0  ;;  %v2099_v58 = vsel %vm208_vm0, %v2095_v3, 0.0 }
 0xe3d   :  { %3115 = vmatpush3.bf16.msra.mxu0 %v3112_v23  ;;  %2077 = vadd.xlane.f32.xlu0 %v2076_v16  ;;  %v2056_v55 = vpop.f32.mrb[19].mxu1  ;;  %v2075_v53 = vmul.f32 %v2973_v26, %v2660_v60  ;;  %v2098_v21 = vmul.f32 %v2973_v26, %v2661_v62 }
 0xe3e   :  { %v3116_v31 = vpack.c.bf16 %v2973_v26, %v2056_v55  ;;  %v2074_v14 = vmul.f32 %v2660_v60, %v2056_v55  ;;  %v2097_v7 = vmul.f32 %v2661_v62, %v2056_v55 }
 0xe3f   :  { %v2085_v56 = vsel %vm208_vm0, %v2075_v53, 0.0  ;;  %v2108_v63 = vsel %vm208_vm0, %v2098_v21, 0.0 }
 0xe40   :  { %3117 = vmatprep.subr.bf16.mxu0 %v3116_v31  ;;  %v2082_v52 = vsel %vm208_vm0, %v2074_v14, 0.0  ;;  %v2105_v5 = vsel %vm208_vm0, %v2097_v7, 0.0 }
 0xe41   :  { %3119 = vmatpush3.bf16.msra.mxu0 %v3116_v31  ;;  %2083 = vadd.xlane.f32.xlu0 %v2082_v52 }
 0xe45   :  { %2086 = vadd.xlane.f32.xlu0 %v2085_v56 }
 0xe49   :  { %2100 = vadd.xlane.f32.xlu0 %v2099_v58 }
 0xe4d   :  { %2103 = vadd.xlane.f32.xlu0 %v2102_v61 }
 0xe51   :  { %2109 = vadd.xlane.f32.xlu0 %v2108_v63 }
 0xe55   :  { %2106 = vadd.xlane.f32.xlu0 %v2105_v5 }
 0xec9   :  { %v2081_v22 = vpop.xlane.xlu1 %2080 }
 0xeca   :  { %v2078_v12 = vpop.xlane.xlu0 %2077 }
 0xecb   :  { %2111 = vxpose.xlu0.b32.start [1/4] (short) (narrow) %v2078_v12, 8 }
 0xece   :  { %v2084_v27 = vpop.xlane.xlu0 %2083 }
 0xecf   :  { %2112 = vxpose.xlu0.b32.cont [2/4] (short) (narrow) %v2081_v22, 8 }
 0xed2   :  { %v2087_v28 = vpop.xlane.xlu0 %2086 }
 0xed3   :  { %2113 = vxpose.xlu0.b32.cont [3/4] (short) (narrow) %v2084_v27, 8  ;;  %v2331_v27 = vld [vmem:[%s3467_s27] sm:$0xff] }
 0xed6   :  { %v2101_v30 = vpop.xlane.xlu0 %2100 }
 0xed7   :  { %2114 = vxpose.xlu0.b32.end [4/4] (short) (narrow) %v2087_v28, 8  ;;  %v2332_v28 = vld [vmem:[%s3467_s27 + $0x8] sm:$0xff] }
 0xeda   :  { %v2104_v4 = vpop.xlane.xlu0 %2103 }
 0xede   :  { %v2110_v10 = vpop.xlane.xlu0 %2109 }
 0xee2   :  { %v2107_v34 = vpop.xlane.xlu0 %2106 }
 0xf4b   :  { %v2127_v13 = vpop.trf.xlu0 }
 0xf4c   :  { %v2146_v19 = vrot.slane %v2127_v13, %v3585_v29  ;;  %v2327_v13 = vld [vmem:[%s3462_s20] sm:$0xff] }
 0xf4e   :  { %v2147_v11 = vadd.f32 %v2146_v19, %v2101_v30  ;;  %v2148_v17 = vadd.f32 %v2146_v19, %v2104_v4  ;;  %v2149_v46 = vadd.f32 %v2146_v19, %v2107_v34  ;;  %v2150_v43 = vadd.f32 %v2146_v19, %v2110_v10  ;;  %v2333_v4 = vld [vmem:[%s3467_s27 + $0x10] sm:$0xff]  ;;  %v2334_v10 = vld [vmem:[%s3467_s27 + $0x18] sm:$0xff]  ;;  %v2328_v19 = vld [vmem:[%s3462_s20 + $0x8] sm:$0xff] }
 0xf4f   :  { %v3120_v30 = vpack.c.bf16 %v2332_v28, %v2331_v27  ;;  %v3124_v34 = vpack.c.bf16 %v2334_v10, %v2333_v4 }
 0xf50   :  { %vm2151_vm2 = vcmp.gt.f32.partialorder %v2147_v11, 0.0  ;;  %v2155_v18 = vmul.f32 0.2, %v2147_v11  ;;  %vm2152_vm5 = vcmp.gt.f32.partialorder %v2148_v17, 0.0  ;;  %v2156_v36 = vmul.f32 0.2, %v2148_v17 }
 0xf51   :  { %v2157_v38 = vmul.f32 0.2, %v2149_v46  ;;  %vm2153_vm7 = vcmp.gt.f32.partialorder %v2149_v46, 0.0  ;;  %v2158_v47 = vmul.f32 0.2, %v2150_v43  ;;  %vm2154_vm9 = vcmp.gt.f32.partialorder %v2150_v43, 0.0  ;;  %3121 = vmatprep.subr.bf16.mxu1 %v3120_v30 }
 0xf52   :  { %v2159_v20 = vsel %vm2151_vm2, %v2147_v11, %v2155_v18  ;;  %v2160_v37 = vsel %vm2152_vm5, %v2148_v17, %v2156_v36  ;;  %3123 = vmatpush3.bf16.msra.mxu1 %v3120_v30  ;;  %v3128_v11 = vpack.c.bf16 %v2328_v19, %v2327_v13  ;;  %v2662_v17 = vld [vmem:[%s3941_s1] ss:$0 sm:$0xff] }
 0xf53   :  { %v2163_v24 = vsel %vm160_vm10, %v2159_v20, -1e+30  ;;  %v2164_v29 = vsel %vm161_vm13, %v2160_v37, -1e+30  ;;  %v2161_v2 = vsel %vm2153_vm7, %v2149_v46, %v2157_v38  ;;  %v2162_v9 = vsel %vm2154_vm9, %v2150_v43, %v2158_v47  ;;  %3125 = vmatprep.subr.bf16.mxu1 %v3124_v34  ;;  %v2329_v38 = vld [vmem:[%s3462_s20 + $0x10] sm:$0xff]  ;;  %v2330_v43 = vld [vmem:[%s3462_s20 + $0x18] sm:$0xff] }
 0xf54   :  { %v2167_v45 = vsel %vm208_vm0, %v2163_v24, -inf  ;;  %v2170_v48 = vsel %vm208_vm0, %v2164_v29, -inf  ;;  %v2165_v8 = vsel %vm162_vm15, %v2161_v2, -1e+30  ;;  %v2166_v33 = vsel %vm163_vm3, %v2162_v9, -1e+30 }
 0xf55   :  { %2168 = vmax.xlane.f32.xlu1 %v2167_v45  ;;  %v2173_v0 = vsel %vm208_vm0, %v2165_v8, -inf  ;;  %v2176_v57 = vsel %vm208_vm0, %v2166_v33, -inf  ;;  %v3132_v2 = vpack.c.bf16 %v2330_v43, %v2329_v38  ;;  %s3316_s20 = smov [#allocation5]  }
 0xf56   :  { %3127 = vmatpush3.bf16.msra.mxu1 %v3124_v34  ;;  %s2549_s27 = sshll.u32 %s3316_s20, 4  ;;  %s2550_s27 = int_to_ptr.vmem [resolvable:$true] %s2549_s27 }
 0xf57   :  { %3129 = vmatprep.subr.bf16.mxu1 %v3128_v11  ;;  %p3263_p6 = scmp.lt.s32.totalorder %s2550_s27, %s2550_s27 }
 0xf59   :  { %2171 = vmax.xlane.f32.xlu1 %v2170_v48 }
 0xf5d   :  { %2174 = vmax.xlane.f32.xlu1 %v2173_v0 }
 0xf61   :  { %2177 = vmax.xlane.f32.xlu1 %v2176_v57 }
 0xfe2   :  { %v2169_v1 = vpop.xlane.xlu1 %2168 }
 0xfe3   :  { %v2179_v39 = vsub.f32 %v2163_v24, %v2169_v1  ;;  %v2646_v24 = vld [vmem:[%s3942_s2] ss:$0 sm:$0xff] }
 0xfe4   :  { %v1819_v47 = vadd.f32 %v2646_v24, %v3844_v6  ;;  %v1824_v57 = vadd.f32 %v3842_v25, %v2646_v24 }
 0xfe5   :  { %v2183_v40 = vmul.f32 1.442695, %v2179_v39 }
 0xfe6   :  { %v2172_v54 = vpop.xlane.xlu1 %2171  ;;  %v1841_v1 = vmul.f32 0.01, %v1819_v47  ;;  %vm1837_vm14 = vcmp.gt.f32.partialorder %v1819_v47, 0.0  ;;  %vm1838_vm1 = vcmp.gt.f32.partialorder %v1824_v57, 0.0 }
 0xfe7   :  { %3230 = vpow2.f32 %v2183_v40  ;;  %v2180_v60 = vsub.f32 %v2164_v29, %v2172_v54  ;;  %v1829_v40 = vadd.f32 %v2646_v24, %v3848_v49 }
 0xfe8   :  { %v1845_v25 = vsel %vm1837_vm14, %v1819_v47, %v1841_v1 }
 0xfe9   :  { %v2185_v50 = vmul.f32 1.442695, %v2180_v60  ;;  %v1842_v60 = vmul.f32 0.01, %v1824_v57  ;;  %vm1839_vm4 = vcmp.gt.f32.partialorder %v1829_v40, 0.0 }
 0xfea   :  { %v2175_v15 = vpop.xlane.xlu1 %2174 }
 0xfeb   :  { %3232 = vpow2.f32 %v2185_v50  ;;  %v2181_v44 = vsub.f32 %v2165_v8, %v2175_v15  ;;  %v1834_v50 = vadd.f32 %v3846_v35, %v2646_v24  ;;  %v1846_v49 = vsel %vm1838_vm1, %v1824_v57, %v1842_v60 }
 0xfed   :  { %v2187_v41 = vmul.f32 1.442695, %v2181_v44  ;;  %v1843_v44 = vmul.f32 0.01, %v1829_v40  ;;  %vm1840_vm6 = vcmp.gt.f32.partialorder %v1834_v50, 0.0 }
 0xfee   :  { %v2178_v23 = vpop.xlane.xlu1 %2177 }
 0xfef   :  { %3234 = vpow2.f32 %v2187_v41  ;;  %v2182_v42 = vsub.f32 %v2166_v33, %v2178_v23  ;;  %v1844_v41 = vmul.f32 0.01, %v1834_v50  ;;  %v1847_v23 = vsel %vm1839_vm4, %v1829_v40, %v1843_v44 }
 0xff1   :  { %v3231_v32 = vpop.eup %3230  ;;  %v2189_v51 = vmul.f32 1.442695, %v2182_v42  ;;  %v1848_v35 = vsel %vm1840_vm6, %v1834_v50, %v1844_v41  ;;  %v2675_v42 = vld [vmem:[%s3472_s4] ss:$0 sm:$0xff]  ;;  %s3258_s4 = scalar_lea.vmem %s2550_s27, 512 }
 0xff2   :  { %v2191_v26 = vsel %vm208_vm0, %v3231_v32, 0.0  ;;  %p3259_p5 = scmp.ne.s32.totalorder %s2550_s27, %s3258_s4  ;;  %p3264_p7 = scmp.lt.s32.totalorder %s3258_s4, %s3258_s4 }
 0xff3   :  { %3236 = vpow2.f32 %v2189_v51  ;;  %2192 = vadd.xlane.f32.xlu1 %v2191_v26 }
 0xff4   :  { %p3265_p8 = por %p3264_p7, %p3263_p6 }
 0xff5   :  { %v3233_v16 = vpop.eup %3232 }
 0xff6   :  { %v2194_v55 = vsel %vm208_vm0, %v3233_v16, 0.0  ;;  %p3266_p9 = pnand %p3265_p8, %p3259_p5 }
 0xff7   :  { %2195 = vadd.xlane.f32.xlu1 %v2194_v55 }
 0xff9   :  { %v3235_v31 = vpop.eup %3234 }
 0xffa   :  { %v2197_v14 = vsel %vm208_vm0, %v3235_v31, 0.0 }
 0xffb   :  { %2198 = vadd.xlane.f32.xlu1 %v2197_v14 }
 0xffd   :  { %v3237_v52 = vpop.eup %3236 }
 0xffe   :  { %v2200_v53 = vsel %vm208_vm0, %v3237_v52, 0.0 }
 0xfff   :  { %2201 = vadd.xlane.f32.xlu1 %v2200_v53 }
0x1080   :  { %v2193_v62 = vpop.xlane.xlu1 %2192 }
0x1081   :  { %3238 = vrcp.f32 %v2193_v62 }
0x1084   :  { %v2196_v56 = vpop.xlane.xlu1 %2195 }
0x1085   :  { %3240 = vrcp.f32 %v2196_v56 }
0x1088   :  { %v2199_v3 = vpop.xlane.xlu1 %2198 }
0x1089   :  { %3242 = vrcp.f32 %v2199_v3 }
0x108b   :  { %v3239_v58 = vpop.eup %3238 }
0x108c   :  { %v2202_v59 = vpop.xlane.xlu1 %2201  ;;  %v2207_v61 = vmul.f32 %v3239_v58, %v3231_v32 }
0x108d   :  { %3244 = vrcp.f32 %v2202_v59 }
0x108e   :  { %2982 = vmatprep.mubr.msk.f32.mxu0 %vm208_vm0, %v2207_v61 }
0x108f   :  { %v3241_v21 = vpop.eup %3240 }
0x1090   :  { %v2208_v63 = vmul.f32 %v3241_v21, %v3233_v16 }
0x1092   :  { %2983 = vmatmul.mubr.msk.f32.vlgmr.msra.gmra.mrb[28].mxu0 %vm208_vm0, %v2208_v63 }
0x1093   :  { %v3243_v7 = vpop.eup %3242 }
0x1094   :  { %v2209_v5 = vmul.f32 %v3243_v7, %v3235_v31 }
0x1096   :  { %2985 = vmatprep.mubr.msk.f32.mxu0 %vm208_vm0, %v2209_v5 }
0x1097   :  { %v3245_v12 = vpop.eup %3244 }
0x1098   :  { %v2210_v22 = vmul.f32 %v3245_v12, %v3237_v52 }
0x109a   :  { %2986 = vmatmul.mubr.msk.f32.gmra.mrb[30].mxu0 %vm208_vm0, %v2210_v22 }
0x1165   :  { %v2984_v46 = vpop.f32.mrb[28].mxu0 }
0x1166   :  { %v2302_v18 = vadd.f32 %v2984_v46, %v2662_v17  ;;  %v2296_v36 = vpop.f32.mrb[29].mxu0 }
0x1167   :  { %v2297_v20 = vadd.f32 %v2662_v17, %v2296_v36 }
0x1168   :  { %v2320_v37 = vmul.f32 0.01, %v2302_v18  ;;  %vm2316_vm10 = vcmp.gt.f32.partialorder %v2302_v18, 0.0 }
0x1169   :  { %vm2315_vm13 = vcmp.gt.f32.partialorder %v2297_v20, 0.0  ;;  %v2319_v45 = vmul.f32 0.01, %v2297_v20 }
0x116a   :  { %v2324_v48 = vsel %vm2316_vm10, %v2302_v18, %v2320_v37 }
0x116b   :  { %v2323_v29 = vsel %vm2315_vm13, %v2297_v20, %v2319_v45 }
0x116c   :  { %2996 = vmatprep.mubr.msk.f32.mxu1 %vm208_vm0, %v2323_v29 }
0x116d   :  { %v2987_v8 = vpop.f32.mrb[30].mxu0  ;;  %2997 = vmatmul.mubr.msk.f32.vlgmr.msra.gmra.mrb[20].mxu1 %vm208_vm0, %v2324_v48 }
0x116e   :  { %v2312_v9 = vadd.f32 %v2987_v8, %v2662_v17  ;;  %v2306_v0 = vpop.f32.mrb[31].mxu0  ;;  %3131 = vmatpush3.bf16.msra.mxu1 %v3128_v11 }
0x116f   :  { %v2307_v33 = vadd.f32 %v2662_v17, %v2306_v0  ;;  %3133 = vmatprep.subr.bf16.mxu1 %v3132_v2 }
0x1170   :  { %v2322_v39 = vmul.f32 0.01, %v2312_v9  ;;  %vm2318_vm15 = vcmp.gt.f32.partialorder %v2312_v9, 0.0 }
0x1171   :  { %vm2317_vm3 = vcmp.gt.f32.partialorder %v2307_v33, 0.0  ;;  %v2321_v6 = vmul.f32 0.01, %v2307_v33 }
0x1172   :  { %3135 = vmatpush3.bf16.msra.mxu1 %v3132_v2  ;;  %v2326_v15 = vsel %vm2318_vm15, %v2312_v9, %v2322_v39 }
0x1173   :  { %v2325_v54 = vsel %vm2317_vm3, %v2307_v33, %v2321_v6 }
0x1174   :  { %2999 = vmatprep.mubr.msk.f32.mxu1 %vm208_vm0, %v2325_v54 }
0x1175   :  { %3000 = vmatmul.mubr.msk.f32.gmra.mrb[22].mxu1 %vm208_vm0, %v2326_v15 }
0x1176   :  { %3010 = vmatprep.mubr.msk.f32.mxu1 %vm208_vm0, %v1845_v25 }
0x1179   :  { %3011 = vmatmul.mubr.msk.f32.vlgmr.msra.gmra.mrb[20].mxu1 %vm208_vm0, %v1846_v49 }
0x117a   :  { %3013 = vmatprep.mubr.msk.f32.mxu1 %vm208_vm0, %v1847_v23 }
0x117d   :  { %3014 = vmatmul.mubr.msk.f32.gmra.mrb[22].mxu1 %vm208_vm0, %v1848_v35 }
0x124c   :  { %v3012_v32 = vpop.f32.mrb[20].mxu1 }
0x124d   :  { %v2537_v51 = vadd.f32 %v3012_v32, %v2675_v42  ;;  %v2510_v26 = vpop.f32.mrb[21].mxu1 }
0x124e   :  { %v2536_v16 = vadd.f32 %v2675_v42, %v2510_v26 }
0x124f   :  { %2541 = vst.msk [vmem:[#allocation5 + $0x8] sm:$0xff] %vm208_vm0, %v2537_v51 }
0x1250   :  { %2540 = vst.msk [vmem:[#allocation5] sm:$0xff] %vm208_vm0, %v2536_v16  ;;  %v3015_v55 = vpop.f32.mrb[22].mxu1 }
0x1251   :  { %v2539_v31 = vadd.f32 %v3015_v55, %v2675_v42  ;;  %v2520_v14 = vpop.f32.mrb[23].mxu1 }
0x1252   :  { %v2538_v52 = vadd.f32 %v2675_v42, %v2520_v14 }
0x1253   :  { %2543 = vst.msk [vmem:[#allocation5 + $0x18] sm:$0xff] %vm208_vm0, %v2539_v31 }
0x1254   :  { %2542 = vst.msk [vmem:[#allocation5 + $0x10] sm:$0xff] %vm208_vm0, %v2538_v52 }
0x1255   :  { %3269 = shalt.err (!%p3266_p9)
}
0x1256   :  { %s3270_s7 = scalar_lea.hbm %s3477_s24, 512 }
0x1257   :  { %p3271_p10 = scmp.ne.s32.totalorder %s3477_s24, %s3270_s7  ;;  %p3274_p11 = scmp.lt.u32.totalorder %s3270_s7, %s3477_s24 }
0x1259   :  { %p3276_p12 = pnand %p3274_p11, %p3271_p10 }
0x125b   :  { %3279 = shalt.err (!%p3276_p12)
}
0x125c   :  { %s3317_s10 = smov 128   ;;  %s3318_s11 = smov 8  }
0x125d   :  { %2555 = dma.vmem_to_hbm [thread:$0]  %s2550_s27, 512, %s3477_s24, [#allocation3], %s3317_s10, %s3317_s10, %s3318_s11  }
0x125e   :  { %3282 = dma.done.wait [#allocation3], 512  }
0x125f   :  { %3283 = vsyncadd [#allocation3], 4294966784 }
0x1260   :  { %2559 = vsyncpa [#allocation3], 1 }
0x1261   :  { %2560 = vsyncpa [#allocation4], 1 }

</bundles_post_ra>
